<compile_context>
chip_gen: v6e
topology: v6e:2x2x1
jax: 0.10.0
libtpu: 0.0.40
codegen_flags: <defaults>
</compile_context>

<pallas_src>
import math
import numpy as np
import jax
import jax.numpy as jnp
from jax import lax
from jax.experimental import pallas as pl
from jax.experimental.pallas import tpu as pltpu

# ------------------------- configuration ------------------------------------
B, T, D = 2, 8, 32          # batch, time, size
H = 4                       # attention heads
DK = D // H                 # per-head dim
HFF = 64                    # positionwise feed-forward hidden units
K_CONV = 3                  # depthwise conv kernel size (odd, "same" padding)
PAD = (K_CONV - 1) // 2
LN_EPS = 1e-12              # espnet transformer LayerNorm eps
BN_EPS = 1e-5               # torch BatchNorm1d default eps (eval mode)
FF_SCALE = 0.5              # macaron feed-forward scale
NEG_INF = -1e30             # finite on purpose: masked scores stay NaN-free
BT = B * T
BHT = B * H * T
SLAB_COLS = max(D, HFF)     # common lane width (64) of both parameter slabs


# ------------------------- static slab layouts -------------------------------
def _layout(entries):
    """entries: [(name, rows, cols)] -> ({name: (row0, rows, cols)}, total_rows).
    Every entry starts on an 8-sublane boundary so in-kernel slices stay aligned."""
    offs, row = {}, 0
    for name, rows, cols in entries:
        offs[name] = (row, rows, cols)
        row += -(-rows // 8) * 8
    return offs, row


_W_ENTRIES = [("wq", D, D), ("wk", D, D), ("wv", D, D), ("wo", D, D),
              ("ffm_w1", D, HFF), ("ffm_w2", HFF, D),
              ("ff_w1", D, HFF), ("ff_w2", HFF, D),
              ("pw1_wa", D, D), ("pw1_wg", D, D), ("pw2_w", D, D)]

_F_ENTRIES = ([(f"ln_g{i}", 1, D) for i in range(5)]           # [macaron, mha, conv, ff, final]
              + [(f"ln_b{i}", 1, D) for i in range(5)]
              + [("bq", 1, D), ("bk", 1, D), ("bv", 1, D), ("bo", 1, D),
                 ("ffm_b1", 1, HFF), ("ffm_b2", 1, D),
                 ("ff_b1", 1, HFF), ("ff_b2", 1, D),
                 ("pw1_ba", 1, D), ("pw1_bg", 1, D)]
              + [(f"dw{k}", 1, D) for k in range(K_CONV)]
              + [("dw_b", 1, D), ("pw2_b", 1, D), ("hsel", BHT, D)])

W_OFF, W_ROWS = _layout(_W_ENTRIES)     # bf16 weight slab (W_ROWS, SLAB_COLS)
F_OFF, F_ROWS = _layout(_F_ENTRIES)     # f32 bias/LN/conv/structure slab

# static attention structure: stacked row r = h*BT + (b*T + t); key column n = b*T + t
_BLOCK_DIAG = ((np.arange(BHT)[:, None] % BT) // T) == (np.arange(BT)[None, :] // T)


def _sigmoid(v):
    # exact (approx reciprocal removed: error compounded through GLU/swish/FFN chain)
    return 1.0 / (1.0 + jnp.exp(-v))


# ------------------------- the Pallas kernel --------------------------------
def encoder_layer_kernel(x_ref, abias_ref, ws_ref, fs_ref, o_ref):
    x = x_ref[...]                  # (B*T, D) f32, batch folded into sublanes
    attn_bias = abias_ref[...]      # (B*H*T, B*T) f32: 0 = attend, NEG_INF = masked

    def fget(name):                 # static, 8-aligned f32 slab slice (free view + load)
        r0, rows, cols = F_OFF[name]
        return fs_ref[r0:r0 + rows, 0:cols]

    def wget(name):                 # static bf16 slab slice
        r0, rows, cols = W_OFF[name]
        return ws_ref[r0:r0 + rows, 0:cols]

    def ln(v, idx):
        mean = jnp.mean(v, axis=-1, keepdims=True)
        var = jnp.mean(jnp.square(v - mean), axis=-1, keepdims=True)
        return (v - mean) * lax.rsqrt(var + LN_EPS) * fget(f"ln_g{idx}") + fget(f"ln_b{idx}")

    def mm(a16, name):              # bf16 MXU matmul, f32 accumulation
        return jnp.dot(a16, wget(name), preferred_element_type=jnp.float32)

    def ffn(v, prefix):             # Linear -> ReLU -> Linear (dropout = identity)
        h = mm(v.astype(jnp.bfloat16), f"{prefix}_w1") + fget(f"{prefix}_b1")
        h = jnp.maximum(h, 0.0)
        return mm(h.astype(jnp.bfloat16), f"{prefix}_w2") + fget(f"{prefix}_b2")

    # ---- macaron feed-forward (pre-norm, 0.5 scale) --------------------------
    residual = x
    x = residual + FF_SCALE * ffn(ln(x, 0), "ffm")

    # ---- multi-headed self-attention: all batches & heads in 2 MXU passes ----
    residual = x
    xn16 = ln(x, 1).astype(jnp.bfloat16)            # cast ONCE, shared by q/k/v
    q = mm(xn16, "wq") + fget("bq")                 # 1/sqrt(dk) folded into wq/bq
    k = mm(xn16, "wk") + fget("bk")
    v = mm(xn16, "wv") + fget("bv")

    hsel = fget("hsel")                             # (BHT, D) static block-diag 0/1
    q_t = jnp.concatenate([q] * H, axis=0)          # heads stacked along sublanes
    q_bd = q_t * hsel                               # zero other heads' channels

    scores = lax.dot_general(                       # (BHT, BT) — one MXU pass
        q_bd.astype(jnp.bfloat16), k.astype(jnp.bfloat16),
        (((1,), (1,)), ((), ())), preferred_element_type=jnp.float32)
    scores = scores + attn_bias                     # batch-block + key-padding mask
    scores = scores - jnp.max(scores, axis=-1, keepdims=True)
    p = jnp.exp(scores)                             # masked entries underflow to 0
    p = p / jnp.sum(p, axis=-1, keepdims=True)      # exact divide (numerics review)

    ctx_st = jnp.dot(p.astype(jnp.bfloat16), v.astype(jnp.bfloat16),
                     preferred_element_type=jnp.float32)   # (BHT, D) — one MXU pass
    ctx_st = ctx_st * hsel                          # keep only this head's channels
    ctx = ctx_st[0:BT, :]
    for h in range(1, H):                           # collapse head blocks (aligned slices)
        ctx = ctx + ctx_st[h * BT:(h + 1) * BT, :]
    x = residual + mm(ctx.astype(jnp.bfloat16), "wo") + fget("bo")

    # ---- conv module: pointwise -> GLU -> depthwise(+folded BN) -> swish -> pointwise
    residual = x
    xn16 = ln(x, 2).astype(jnp.bfloat16)            # cast ONCE, shared by GLU halves
    val = mm(xn16, "pw1_wa") + fget("pw1_ba")       # lane-aligned GLU halves
    gate = mm(xn16, "pw1_wg") + fget("pw1_bg")
    y = val * _sigmoid(gate)

    t_in = lax.broadcasted_iota(jnp.int32, (BT, 1), 0) % T   # time within batch
    acc = y * fget(f"dw{PAD}")                      # center tap (offset 0)
    for kk in range(K_CONV):                        # static unroll over taps
        off = kk - PAD
        if off == 0:
            continue
        shifted = pltpu.roll(y, shift=(-off) % BT, axis=0)   # XLU, not a pad/concat
        valid = (t_in + off >= 0) & (t_in + off < T)         # don't cross batch edges
        acc = acc + jnp.where(valid, shifted * fget(f"dw{kk}"), 0.0)
    acc = acc + fget("dw_b")                        # eval BatchNorm already folded
    acc = acc * _sigmoid(acc)                       # swish
    x = residual + mm(acc.astype(jnp.bfloat16), "pw2_w") + fget("pw2_b")

    # ---- feed-forward (pre-norm, 0.5 scale) ----------------------------------
    residual = x
    x = residual + FF_SCALE * ffn(ln(x, 3), "ff")

    # ---- final layer norm -----------------------------------------------------
    o_ref[...] = ln(x, 4)


# ------------------------- wrapper -------------------------------------------
@jax.jit
def encoder_layer(x, mask, wslab, fslab):
    x_flat = x.reshape(BT, D)                       # free row-major collapse (XLA side)
    # Fold the (static) batch-block structure and the (runtime) key-padding mask
    # into one additive bias outside the kernel's serial chain.
    attend = jnp.logical_and(jnp.asarray(_BLOCK_DIAG), mask.reshape(1, BT) > 0.0)
    attn_bias = jnp.where(attend, 0.0, NEG_INF).astype(jnp.float32)   # (BHT, BT)
    out_flat = pl.pallas_call(
        encoder_layer_kernel,
        out_shape=jax.ShapeDtypeStruct((BT, D), jnp.float32),
        in_specs=[pl.BlockSpec(memory_space=pltpu.MemorySpace.VMEM)] * 4,
        out_specs=pl.BlockSpec(memory_space=pltpu.MemorySpace.VMEM),
    )(x_flat, attn_bias, wslab, fslab)
    return out_flat.reshape(B, T, D), mask


def pack_slab(offsets, total_rows, values, dtype):
    """Init-time packing of many small parameters into one contiguous slab."""
    slab = jnp.zeros((total_rows, SLAB_COLS), dtype)
    for name, arr in values.items():
        r0, rows, cols = offsets[name]
        assert arr.shape == (rows, cols), (name, arr.shape, (rows, cols))
        slab = slab.at[r0:r0 + rows, 0:cols].set(arr.astype(dtype))
    return slab


# ------------------------- deterministic setup & run --------------------------
if __name__ == "__main__":
    key = jax.random.PRNGKey(0)
    k_iter = iter(jax.random.split(key, 48))

    def nrm(shape, scale=0.1):
        return scale * jax.random.normal(next(k_iter), shape, jnp.float32)

    # inputs
    x = jax.random.normal(next(k_iter), (B, T, D), jnp.float32)
    mask = jnp.ones((B, 1, T), jnp.float32).at[1, 0, T - 1].set(0.0)  # mask last frame of batch 1

    # raw parameters (as the PyTorch module would hold them)
    ln_g = 1.0 + nrm((5, D))          # rows: [macaron, mha, conv, ff, final]
    ln_b = nrm((5, D))
    wq, wk, wv, wo = nrm((D, D)), nrm((D, D)), nrm((D, D)), nrm((D, D))
    bq, bk, bv, bo = nrm((1, D)), nrm((1, D)), nrm((1, D)), nrm((1, D))
    ffm_w1, ffm_b1 = nrm((D, HFF)), nrm((1, HFF))
    ffm_w2, ffm_b2 = nrm((HFF, D)), nrm((1, D))
    ff_w1, ff_b1 = nrm((D, HFF)), nrm((1, HFF))
    ff_w2, ff_b2 = nrm((HFF, D)), nrm((1, D))
    pw1_wa, pw1_ba = nrm((D, D)), nrm((1, D))     # GLU value half of pointwise_conv1
    pw1_wg, pw1_bg = nrm((D, D)), nrm((1, D))     # GLU gate half of pointwise_conv1
    dw_w, dw_b = nrm((K_CONV, D)), nrm((1, D))
    bn_gamma = 1.0 + nrm((1, D))
    bn_beta = nrm((1, D))
    bn_mean = nrm((1, D))
    bn_var = 0.5 + jnp.abs(nrm((1, D)))
    pw2_w, pw2_b = nrm((D, D)), nrm((1, D))

    # --- init-time fusion / folding (exact algebra, not per-call wrapper work) ---
    inv_sqrt_dk = 1.0 / math.sqrt(DK)
    wq_s, bq_s = wq * inv_sqrt_dk, bq * inv_sqrt_dk        # fold 1/sqrt(dk) into Q proj
    bn_scale = bn_gamma * jax.lax.rsqrt(bn_var + BN_EPS)   # fold eval BatchNorm into
    dw_w_f = dw_w * bn_scale                               # the depthwise conv
    dw_b_f = (dw_b - bn_mean) * bn_scale + bn_beta
    hsel = jnp.asarray(                                    # static head block-diag mask
        (np.arange(BHT)[:, None] // BT) == (np.arange(D)[None, :] // DK), jnp.float32)

    w_vals = {"wq": wq_s, "wk": wk, "wv": wv, "wo": wo,
              "ffm_w1": ffm_w1, "ffm_w2": ffm_w2, "ff_w1": ff_w1, "ff_w2": ff_w2,
              "pw1_wa": pw1_wa, "pw1_wg": pw1_wg, "pw2_w": pw2_w}
    f_vals = {**{f"ln_g{i}": ln_g[i:i + 1] for i in range(5)},
              **{f"ln_b{i}": ln_b[i:i + 1] for i in range(5)},
              "bq": bq_s, "bk": bk, "bv": bv, "bo": bo,
              "ffm_b1": ffm_b1, "ffm_b2": ffm_b2, "ff_b1": ff_b1, "ff_b2": ff_b2,
              "pw1_ba": pw1_ba, "pw1_bg": pw1_bg,
              **{f"dw{k}": dw_w_f[k:k + 1] for k in range(K_CONV)},
              "dw_b": dw_b_f, "pw2_b": pw2_b, "hsel": hsel}

    wslab = pack_slab(W_OFF, W_ROWS, w_vals, jnp.bfloat16)   # one bf16 weight slab
    fslab = pack_slab(F_OFF, F_ROWS, f_vals, jnp.float32)    # one f32 bias/LN/conv slab

    # TODO(synk): dropout is identity (eval mode); rel-pos attention / cache paths unused.
    y, mask_out = encoder_layer(x, mask, wslab, fslab)
    jax.block_until_ready(y)
    assert y.shape == (B, T, D)
    print("KERNEL_OK")
</pallas_src>

<mosaic_0001>
module attributes {stable_mosaic.version = 11 : i64} {
  func.func @encoder_layer_kernel(%arg0: memref<16x32xf32, #tpu.memory_space<vmem>>, %arg1: memref<64x16xf32, #tpu.memory_space<vmem>>, %arg2: memref<416x64xbf16, #tpu.memory_space<vmem>>, %arg3: memref<264x64xf32, #tpu.memory_space<vmem>>, %arg4: memref<16x32xf32, #tpu.memory_space<vmem>>) attributes {dimension_semantics = [], scalar_prefetch = 0 : i64, scratch_operands = 0 : i64, tpu.core_type = #tpu.core_type<tc>} {
    %c0 = arith.constant 0 : index
    %c0_0 = arith.constant 0 : index
    %0 = vector.load %arg0[%c0, %c0_0] : memref<16x32xf32, #tpu.memory_space<vmem>>, vector<16x32xf32>
    %c0_1 = arith.constant 0 : index
    %c0_2 = arith.constant 0 : index
    %1 = vector.load %arg1[%c0_1, %c0_2] : memref<64x16xf32, #tpu.memory_space<vmem>>, vector<64x16xf32>
    %cst = arith.constant dense<0.000000e+00> : vector<16xf32>
    %2 = vector.multi_reduction <add>, %0, %cst [1] : vector<16x32xf32> to vector<16xf32>
    %3 = vector.shape_cast %2 : vector<16xf32> to vector<16x1xf32>
    %cst_3 = arith.constant 3.200000e+01 : f32
    %4 = vector.broadcast %cst_3 : f32 to vector<16x1xf32>
    %5 = arith.divf %3, %4 : vector<16x1xf32>
    %6 = vector.broadcast %5 : vector<16x1xf32> to vector<16x32xf32>
    %7 = arith.subf %0, %6 : vector<16x32xf32>
    %8 = arith.mulf %7, %7 : vector<16x32xf32>
    %cst_4 = arith.constant dense<0.000000e+00> : vector<16xf32>
    %9 = vector.multi_reduction <add>, %8, %cst_4 [1] : vector<16x32xf32> to vector<16xf32>
    %10 = vector.shape_cast %9 : vector<16xf32> to vector<16x1xf32>
    %cst_5 = arith.constant 3.200000e+01 : f32
    %11 = vector.broadcast %cst_5 : f32 to vector<16x1xf32>
    %12 = arith.divf %10, %11 : vector<16x1xf32>
    %13 = vector.broadcast %5 : vector<16x1xf32> to vector<16x32xf32>
    %14 = arith.subf %0, %13 : vector<16x32xf32>
    %cst_6 = arith.constant 9.99999996E-13 : f32
    %15 = vector.broadcast %cst_6 : f32 to vector<16x1xf32>
    %16 = arith.addf %12, %15 : vector<16x1xf32>
    %17 = math.rsqrt %16 : vector<16x1xf32>
    %18 = vector.broadcast %17 : vector<16x1xf32> to vector<16x32xf32>
    %19 = arith.mulf %14, %18 : vector<16x32xf32>
    %c0_7 = arith.constant 0 : index
    %c0_8 = arith.constant 0 : index
    %20 = vector.load %arg3[%c0_7, %c0_8] : memref<264x64xf32, #tpu.memory_space<vmem>>, vector<1x32xf32>
    %21 = vector.broadcast %20 : vector<1x32xf32> to vector<16x32xf32>
    %22 = arith.mulf %19, %21 : vector<16x32xf32>
    %c40 = arith.constant 40 : index
    %c0_9 = arith.constant 0 : index
    %23 = vector.load %arg3[%c40, %c0_9] : memref<264x64xf32, #tpu.memory_space<vmem>>, vector<1x32xf32>
    %24 = vector.broadcast %23 : vector<1x32xf32> to vector<16x32xf32>
    %25 = arith.addf %22, %24 : vector<16x32xf32>
    %26 = arith.truncf %25 : vector<16x32xf32> to vector<16x32xbf16>
    %c128 = arith.constant 128 : index
    %c0_10 = arith.constant 0 : index
    %27 = vector.load %arg2[%c128, %c0_10] : memref<416x64xbf16, #tpu.memory_space<vmem>>, vector<32x64xbf16>
    %cst_11 = arith.constant dense<0.000000e+00> : vector<16x64xf32>
    %28 = tpu.matmul %26, %27, %cst_11 {dimension_numbers = #tpu.dot_dimension_numbers<[1], [0], [0], [1], [0, 0, 1, 1], [], []>} : vector<16x32xbf16>, vector<32x64xbf16>, vector<16x64xf32> -> vector<16x64xf32>
    %c112 = arith.constant 112 : index
    %c0_12 = arith.constant 0 : index
    %29 = vector.load %arg3[%c112, %c0_12] : memref<264x64xf32, #tpu.memory_space<vmem>>, vector<1x64xf32>
    %30 = vector.broadcast %29 : vector<1x64xf32> to vector<16x64xf32>
    %31 = arith.addf %28, %30 : vector<16x64xf32>
    %cst_13 = arith.constant 0.000000e+00 : f32
    %32 = vector.broadcast %cst_13 : f32 to vector<16x64xf32>
    %33 = arith.maximumf %31, %32 : vector<16x64xf32>
    %34 = arith.truncf %33 : vector<16x64xf32> to vector<16x64xbf16>
    %c160 = arith.constant 160 : index
    %c0_14 = arith.constant 0 : index
    %35 = vector.load %arg2[%c160, %c0_14] : memref<416x64xbf16, #tpu.memory_space<vmem>>, vector<64x32xbf16>
    %cst_15 = arith.constant dense<0.000000e+00> : vector<16x32xf32>
    %36 = tpu.matmul %34, %35, %cst_15 {dimension_numbers = #tpu.dot_dimension_numbers<[1], [0], [0], [1], [0, 0, 1, 1], [], []>} : vector<16x64xbf16>, vector<64x32xbf16>, vector<16x32xf32> -> vector<16x32xf32>
    %c120 = arith.constant 120 : index
    %c0_16 = arith.constant 0 : index
    %37 = vector.load %arg3[%c120, %c0_16] : memref<264x64xf32, #tpu.memory_space<vmem>>, vector<1x32xf32>
    %38 = vector.broadcast %37 : vector<1x32xf32> to vector<16x32xf32>
    %39 = arith.addf %36, %38 : vector<16x32xf32>
    %cst_17 = arith.constant 5.000000e-01 : f32
    %40 = vector.broadcast %cst_17 : f32 to vector<16x32xf32>
    %41 = arith.mulf %40, %39 : vector<16x32xf32>
    %42 = arith.addf %0, %41 : vector<16x32xf32>
    %cst_18 = arith.constant dense<0.000000e+00> : vector<16xf32>
    %43 = vector.multi_reduction <add>, %42, %cst_18 [1] : vector<16x32xf32> to vector<16xf32>
    %44 = vector.shape_cast %43 : vector<16xf32> to vector<16x1xf32>
    %cst_19 = arith.constant 3.200000e+01 : f32
    %45 = vector.broadcast %cst_19 : f32 to vector<16x1xf32>
    %46 = arith.divf %44, %45 : vector<16x1xf32>
    %47 = vector.broadcast %46 : vector<16x1xf32> to vector<16x32xf32>
    %48 = arith.subf %42, %47 : vector<16x32xf32>
    %49 = arith.mulf %48, %48 : vector<16x32xf32>
    %cst_20 = arith.constant dense<0.000000e+00> : vector<16xf32>
    %50 = vector.multi_reduction <add>, %49, %cst_20 [1] : vector<16x32xf32> to vector<16xf32>
    %51 = vector.shape_cast %50 : vector<16xf32> to vector<16x1xf32>
    %cst_21 = arith.constant 3.200000e+01 : f32
    %52 = vector.broadcast %cst_21 : f32 to vector<16x1xf32>
    %53 = arith.divf %51, %52 : vector<16x1xf32>
    %54 = vector.broadcast %46 : vector<16x1xf32> to vector<16x32xf32>
    %55 = arith.subf %42, %54 : vector<16x32xf32>
    %cst_22 = arith.constant 9.99999996E-13 : f32
    %56 = vector.broadcast %cst_22 : f32 to vector<16x1xf32>
    %57 = arith.addf %53, %56 : vector<16x1xf32>
    %58 = math.rsqrt %57 : vector<16x1xf32>
    %59 = vector.broadcast %58 : vector<16x1xf32> to vector<16x32xf32>
    %60 = arith.mulf %55, %59 : vector<16x32xf32>
    %c8 = arith.constant 8 : index
    %c0_23 = arith.constant 0 : index
    %61 = vector.load %arg3[%c8, %c0_23] : memref<264x64xf32, #tpu.memory_space<vmem>>, vector<1x32xf32>
    %62 = vector.broadcast %61 : vector<1x32xf32> to vector<16x32xf32>
    %63 = arith.mulf %60, %62 : vector<16x32xf32>
    %c48 = arith.constant 48 : index
    %c0_24 = arith.constant 0 : index
    %64 = vector.load %arg3[%c48, %c0_24] : memref<264x64xf32, #tpu.memory_space<vmem>>, vector<1x32xf32>
    %65 = vector.broadcast %64 : vector<1x32xf32> to vector<16x32xf32>
    %66 = arith.addf %63, %65 : vector<16x32xf32>
    %67 = arith.truncf %66 : vector<16x32xf32> to vector<16x32xbf16>
    %c0_25 = arith.constant 0 : index
    %c0_26 = arith.constant 0 : index
    %68 = vector.load %arg2[%c0_25, %c0_26] : memref<416x64xbf16, #tpu.memory_space<vmem>>, vector<32x32xbf16>
    %cst_27 = arith.constant dense<0.000000e+00> : vector<16x32xf32>
    %69 = tpu.matmul %67, %68, %cst_27 {dimension_numbers = #tpu.dot_dimension_numbers<[1], [0], [0], [1], [0, 0, 1, 1], [], []>} : vector<16x32xbf16>, vector<32x32xbf16>, vector<16x32xf32> -> vector<16x32xf32>
    %c80 = arith.constant 80 : index
    %c0_28 = arith.constant 0 : index
    %70 = vector.load %arg3[%c80, %c0_28] : memref<264x64xf32, #tpu.memory_space<vmem>>, vector<1x32xf32>
    %71 = vector.broadcast %70 : vector<1x32xf32> to vector<16x32xf32>
    %72 = arith.addf %69, %71 : vector<16x32xf32>
    %c32 = arith.constant 32 : index
    %c0_29 = arith.constant 0 : index
    %73 = vector.load %arg2[%c32, %c0_29] : memref<416x64xbf16, #tpu.memory_space<vmem>>, vector<32x32xbf16>
    %cst_30 = arith.constant dense<0.000000e+00> : vector<16x32xf32>
    %74 = tpu.matmul %67, %73, %cst_30 {dimension_numbers = #tpu.dot_dimension_numbers<[1], [0], [0], [1], [0, 0, 1, 1], [], []>} : vector<16x32xbf16>, vector<32x32xbf16>, vector<16x32xf32> -> vector<16x32xf32>
    %c88 = arith.constant 88 : index
    %c0_31 = arith.constant 0 : index
    %75 = vector.load %arg3[%c88, %c0_31] : memref<264x64xf32, #tpu.memory_space<vmem>>, vector<1x32xf32>
    %76 = vector.broadcast %75 : vector<1x32xf32> to vector<16x32xf32>
    %77 = arith.addf %74, %76 : vector<16x32xf32>
    %c64 = arith.constant 64 : index
    %c0_32 = arith.constant 0 : index
    %78 = vector.load %arg2[%c64, %c0_32] : memref<416x64xbf16, #tpu.memory_space<vmem>>, vector<32x32xbf16>
    %cst_33 = arith.constant dense<0.000000e+00> : vector<16x32xf32>
    %79 = tpu.matmul %67, %78, %cst_33 {dimension_numbers = #tpu.dot_dimension_numbers<[1], [0], [0], [1], [0, 0, 1, 1], [], []>} : vector<16x32xbf16>, vector<32x32xbf16>, vector<16x32xf32> -> vector<16x32xf32>
    %c96 = arith.constant 96 : index
    %c0_34 = arith.constant 0 : index
    %80 = vector.load %arg3[%c96, %c0_34] : memref<264x64xf32, #tpu.memory_space<vmem>>, vector<1x32xf32>
    %81 = vector.broadcast %80 : vector<1x32xf32> to vector<16x32xf32>
    %82 = arith.addf %79, %81 : vector<16x32xf32>
    %c200 = arith.constant 200 : index
    %c0_35 = arith.constant 0 : index
    %83 = vector.load %arg3[%c200, %c0_35] : memref<264x64xf32, #tpu.memory_space<vmem>>, vector<64x32xf32>
    %84 = tpu.concatenate %72, %72, %72, %72 in 0 : vector<16x32xf32>, vector<16x32xf32>, vector<16x32xf32>, vector<16x32xf32> -> vector<64x32xf32>
    %85 = arith.mulf %84, %83 : vector<64x32xf32>
    %86 = arith.truncf %85 : vector<64x32xf32> to vector<64x32xbf16>
    %87 = arith.truncf %77 : vector<16x32xf32> to vector<16x32xbf16>
    %cst_36 = arith.constant dense<0.000000e+00> : vector<64x16xf32>
    %88 = tpu.matmul %86, %87, %cst_36 {dimension_numbers = #tpu.dot_dimension_numbers<[1], [1], [0], [0], [0, 0, 1, 0], [], []>} : vector<64x32xbf16>, vector<16x32xbf16>, vector<64x16xf32> -> vector<64x16xf32>
    %89 = arith.addf %88, %1 : vector<64x16xf32>
    %cst_37 = arith.constant dense<0xFF800000> : vector<64xf32>
    %90 = vector.multi_reduction <maximumf>, %89, %cst_37 [1] : vector<64x16xf32> to vector<64xf32>
    %91 = vector.shape_cast %90 : vector<64xf32> to vector<64x1xf32>
    %92 = vector.broadcast %91 : vector<64x1xf32> to vector<64x16xf32>
    %93 = arith.subf %89, %92 : vector<64x16xf32>
    %94 = math.exp %93 : vector<64x16xf32>
    %cst_38 = arith.constant dense<0.000000e+00> : vector<64xf32>
    %95 = vector.multi_reduction <add>, %94, %cst_38 [1] : vector<64x16xf32> to vector<64xf32>
    %96 = vector.shape_cast %95 : vector<64xf32> to vector<64x1xf32>
    %97 = vector.broadcast %96 : vector<64x1xf32> to vector<64x16xf32>
    %98 = arith.divf %94, %97 : vector<64x16xf32>
    %99 = arith.truncf %98 : vector<64x16xf32> to vector<64x16xbf16>
    %100 = arith.truncf %82 : vector<16x32xf32> to vector<16x32xbf16>
    %cst_39 = arith.constant dense<0.000000e+00> : vector<64x32xf32>
    %101 = tpu.matmul %99, %100, %cst_39 {dimension_numbers = #tpu.dot_dimension_numbers<[1], [0], [0], [1], [0, 0, 1, 1], [], []>} : vector<64x16xbf16>, vector<16x32xbf16>, vector<64x32xf32> -> vector<64x32xf32>
    %102 = arith.mulf %101, %83 : vector<64x32xf32>
    %103 = vector.extract_strided_slice %102 {offsets = [0, 0], sizes = [16, 32], strides = [1, 1]} : vector<64x32xf32> to vector<16x32xf32>
    %104 = vector.extract_strided_slice %102 {offsets = [16, 0], sizes = [16, 32], strides = [1, 1]} : vector<64x32xf32> to vector<16x32xf32>
    %105 = arith.addf %103, %104 : vector<16x32xf32>
    %106 = vector.extract_strided_slice %102 {offsets = [32, 0], sizes = [16, 32], strides = [1, 1]} : vector<64x32xf32> to vector<16x32xf32>
    %107 = arith.addf %105, %106 : vector<16x32xf32>
    %108 = vector.extract_strided_slice %102 {offsets = [48, 0], sizes = [16, 32], strides = [1, 1]} : vector<64x32xf32> to vector<16x32xf32>
    %109 = arith.addf %107, %108 : vector<16x32xf32>
    %110 = arith.truncf %109 : vector<16x32xf32> to vector<16x32xbf16>
    %c96_40 = arith.constant 96 : index
    %c0_41 = arith.constant 0 : index
    %111 = vector.load %arg2[%c96_40, %c0_41] : memref<416x64xbf16, #tpu.memory_space<vmem>>, vector<32x32xbf16>
    %cst_42 = arith.constant dense<0.000000e+00> : vector<16x32xf32>
    %112 = tpu.matmul %110, %111, %cst_42 {dimension_numbers = #tpu.dot_dimension_numbers<[1], [0], [0], [1], [0, 0, 1, 1], [], []>} : vector<16x32xbf16>, vector<32x32xbf16>, vector<16x32xf32> -> vector<16x32xf32>
    %113 = arith.addf %42, %112 : vector<16x32xf32>
    %c104 = arith.constant 104 : index
    %c0_43 = arith.constant 0 : index
    %114 = vector.load %arg3[%c104, %c0_43] : memref<264x64xf32, #tpu.memory_space<vmem>>, vector<1x32xf32>
    %115 = vector.broadcast %114 : vector<1x32xf32> to vector<16x32xf32>
    %116 = arith.addf %113, %115 : vector<16x32xf32>
    %cst_44 = arith.constant dense<0.000000e+00> : vector<16xf32>
    %117 = vector.multi_reduction <add>, %116, %cst_44 [1] : vector<16x32xf32> to vector<16xf32>
    %118 = vector.shape_cast %117 : vector<16xf32> to vector<16x1xf32>
    %cst_45 = arith.constant 3.200000e+01 : f32
    %119 = vector.broadcast %cst_45 : f32 to vector<16x1xf32>
    %120 = arith.divf %118, %119 : vector<16x1xf32>
    %121 = vector.broadcast %120 : vector<16x1xf32> to vector<16x32xf32>
    %122 = arith.subf %116, %121 : vector<16x32xf32>
    %123 = arith.mulf %122, %122 : vector<16x32xf32>
    %cst_46 = arith.constant dense<0.000000e+00> : vector<16xf32>
    %124 = vector.multi_reduction <add>, %123, %cst_46 [1] : vector<16x32xf32> to vector<16xf32>
    %125 = vector.shape_cast %124 : vector<16xf32> to vector<16x1xf32>
    %cst_47 = arith.constant 3.200000e+01 : f32
    %126 = vector.broadcast %cst_47 : f32 to vector<16x1xf32>
    %127 = arith.divf %125, %126 : vector<16x1xf32>
    %128 = vector.broadcast %120 : vector<16x1xf32> to vector<16x32xf32>
    %129 = arith.subf %116, %128 : vector<16x32xf32>
    %cst_48 = arith.constant 9.99999996E-13 : f32
    %130 = vector.broadcast %cst_48 : f32 to vector<16x1xf32>
    %131 = arith.addf %127, %130 : vector<16x1xf32>
    %132 = math.rsqrt %131 : vector<16x1xf32>
    %133 = vector.broadcast %132 : vector<16x1xf32> to vector<16x32xf32>
    %134 = arith.mulf %129, %133 : vector<16x32xf32>
    %c16 = arith.constant 16 : index
    %c0_49 = arith.constant 0 : index
    %135 = vector.load %arg3[%c16, %c0_49] : memref<264x64xf32, #tpu.memory_space<vmem>>, vector<1x32xf32>
    %136 = vector.broadcast %135 : vector<1x32xf32> to vector<16x32xf32>
    %137 = arith.mulf %134, %136 : vector<16x32xf32>
    %c56 = arith.constant 56 : index
    %c0_50 = arith.constant 0 : index
    %138 = vector.load %arg3[%c56, %c0_50] : memref<264x64xf32, #tpu.memory_space<vmem>>, vector<1x32xf32>
    %139 = vector.broadcast %138 : vector<1x32xf32> to vector<16x32xf32>
    %140 = arith.addf %137, %139 : vector<16x32xf32>
    %141 = arith.truncf %140 : vector<16x32xf32> to vector<16x32xbf16>
    %c320 = arith.constant 320 : index
    %c0_51 = arith.constant 0 : index
    %142 = vector.load %arg2[%c320, %c0_51] : memref<416x64xbf16, #tpu.memory_space<vmem>>, vector<32x32xbf16>
    %cst_52 = arith.constant dense<0.000000e+00> : vector<16x32xf32>
    %143 = tpu.matmul %141, %142, %cst_52 {dimension_numbers = #tpu.dot_dimension_numbers<[1], [0], [0], [1], [0, 0, 1, 1], [], []>} : vector<16x32xbf16>, vector<32x32xbf16>, vector<16x32xf32> -> vector<16x32xf32>
    %c144 = arith.constant 144 : index
    %c0_53 = arith.constant 0 : index
    %144 = vector.load %arg3[%c144, %c0_53] : memref<264x64xf32, #tpu.memory_space<vmem>>, vector<1x32xf32>
    %145 = vector.broadcast %144 : vector<1x32xf32> to vector<16x32xf32>
    %146 = arith.addf %143, %145 : vector<16x32xf32>
    %c352 = arith.constant 352 : index
    %c0_54 = arith.constant 0 : index
    %147 = vector.load %arg2[%c352, %c0_54] : memref<416x64xbf16, #tpu.memory_space<vmem>>, vector<32x32xbf16>
    %cst_55 = arith.constant dense<0.000000e+00> : vector<16x32xf32>
    %148 = tpu.matmul %141, %147, %cst_55 {dimension_numbers = #tpu.dot_dimension_numbers<[1], [0], [0], [1], [0, 0, 1, 1], [], []>} : vector<16x32xbf16>, vector<32x32xbf16>, vector<16x32xf32> -> vector<16x32xf32>
    %c152 = arith.constant 152 : index
    %c0_56 = arith.constant 0 : index
    %149 = vector.load %arg3[%c152, %c0_56] : memref<264x64xf32, #tpu.memory_space<vmem>>, vector<1x32xf32>
    %150 = vector.broadcast %149 : vector<1x32xf32> to vector<16x32xf32>
    %151 = arith.addf %148, %150 : vector<16x32xf32>
    %cst_57 = arith.constant 0.000000e+00 : f32
    %152 = vector.broadcast %cst_57 : f32 to vector<16x32xf32>
    %153 = arith.subf %152, %151 : vector<16x32xf32>
    %154 = math.exp %153 : vector<16x32xf32>
    %cst_58 = arith.constant 1.000000e+00 : f32
    %155 = vector.broadcast %cst_58 : f32 to vector<16x32xf32>
    %156 = arith.addf %155, %154 : vector<16x32xf32>
    %cst_59 = arith.constant 1.000000e+00 : f32
    %157 = vector.broadcast %cst_59 : f32 to vector<16x32xf32>
    %158 = arith.divf %157, %156 : vector<16x32xf32>
    %159 = arith.mulf %146, %158 : vector<16x32xf32>
    %160 = tpu.iota {dimensions = array<i32: 0>} : vector<16x1xi32>
    %c8_i32 = arith.constant 8 : i32
    %c0_i32 = arith.constant 0 : i32
    %161 = arith.cmpi eq, %c8_i32, %c0_i32 : i32
    %c1_i32 = arith.constant 1 : i32
    %162 = arith.select %161, %c1_i32, %c8_i32 : i32
    %163 = vector.broadcast %162 : i32 to vector<16x1xi32>
    %164 = arith.remsi %160, %163 : vector<16x1xi32>
    %c0_i32_60 = arith.constant 0 : i32
    %165 = vector.broadcast %c0_i32_60 : i32 to vector<16x1xi32>
    %166 = arith.cmpi ne, %164, %165 : vector<16x1xi32>
    %c0_i32_61 = arith.constant 0 : i32
    %167 = vector.broadcast %c0_i32_61 : i32 to vector<16x1xi32>
    %168 = arith.cmpi slt, %164, %167 : vector<16x1xi32>
    %c0_i32_62 = arith.constant 0 : i32
    %169 = arith.cmpi slt, %162, %c0_i32_62 : i32
    %170 = vector.broadcast %169 : i1 to vector<16x1xi1>
    %171 = vector.broadcast %170 : vector<16x1xi1> to vector<16x1xi1>
    %172 = arith.xori %168, %171 : vector<16x1xi1>
    %173 = arith.andi %172, %166 : vector<16x1xi1>
    %174 = vector.broadcast %162 : i32 to vector<16x1xi32>
    %175 = arith.addi %164, %174 : vector<16x1xi32>
    %176 = arith.select %173, %175, %164 : vector<16x1xi1>, vector<16x1xi32>
    %c168 = arith.constant 168 : index
    %c0_63 = arith.constant 0 : index
    %177 = vector.load %arg3[%c168, %c0_63] : memref<264x64xf32, #tpu.memory_space<vmem>>, vector<1x32xf32>
    %178 = vector.broadcast %177 : vector<1x32xf32> to vector<16x32xf32>
    %179 = arith.mulf %159, %178 : vector<16x32xf32>
    %c1_i32_64 = arith.constant 1 : i32
    %180 = tpu.dynamic_rotate %159 by %c1_i32_64 dim 0 : vector<16x32xf32>, i32 -> vector<16x32xf32>
    %c-1_i32 = arith.constant -1 : i32
    %181 = vector.broadcast %c-1_i32 : i32 to vector<16x1xi32>
    %182 = arith.addi %176, %181 : vector<16x1xi32>
    %c0_i32_65 = arith.constant 0 : i32
    %183 = vector.broadcast %c0_i32_65 : i32 to vector<16x1xi32>
    %184 = arith.cmpi sge, %182, %183 : vector<16x1xi32>
    %c-1_i32_66 = arith.constant -1 : i32
    %185 = vector.broadcast %c-1_i32_66 : i32 to vector<16x1xi32>
    %186 = arith.addi %176, %185 : vector<16x1xi32>
    %c8_i32_67 = arith.constant 8 : i32
    %187 = vector.broadcast %c8_i32_67 : i32 to vector<16x1xi32>
    %188 = arith.cmpi slt, %186, %187 : vector<16x1xi32>
    %189 = arith.andi %184, %188 : vector<16x1xi1>
    %c160_68 = arith.constant 160 : index
    %c0_69 = arith.constant 0 : index
    %190 = vector.load %arg3[%c160_68, %c0_69] : memref<264x64xf32, #tpu.memory_space<vmem>>, vector<1x32xf32>
    %191 = vector.broadcast %190 : vector<1x32xf32> to vector<16x32xf32>
    %192 = arith.mulf %180, %191 : vector<16x32xf32>
    %cst_70 = arith.constant 0.000000e+00 : f32
    %193 = vector.shape_cast %189 : vector<16x1xi1> to vector<16x1xi1>
    %194 = vector.broadcast %193 : vector<16x1xi1> to vector<16x32xi1>
    %195 = vector.broadcast %cst_70 : f32 to vector<16x32xf32>
    %196 = arith.select %194, %192, %195 : vector<16x32xi1>, vector<16x32xf32>
    %197 = arith.addf %179, %196 : vector<16x32xf32>
    %c15_i32 = arith.constant 15 : i32
    %198 = tpu.dynamic_rotate %159 by %c15_i32 dim 0 : vector<16x32xf32>, i32 -> vector<16x32xf32>
    %c1_i32_71 = arith.constant 1 : i32
    %199 = vector.broadcast %c1_i32_71 : i32 to vector<16x1xi32>
    %200 = arith.addi %176, %199 : vector<16x1xi32>
    %c0_i32_72 = arith.constant 0 : i32
    %201 = vector.broadcast %c0_i32_72 : i32 to vector<16x1xi32>
    %202 = arith.cmpi sge, %200, %201 : vector<16x1xi32>
    %c1_i32_73 = arith.constant 1 : i32
    %203 = vector.broadcast %c1_i32_73 : i32 to vector<16x1xi32>
    %204 = arith.addi %176, %203 : vector<16x1xi32>
    %c8_i32_74 = arith.constant 8 : i32
    %205 = vector.broadcast %c8_i32_74 : i32 to vector<16x1xi32>
    %206 = arith.cmpi slt, %204, %205 : vector<16x1xi32>
    %207 = arith.andi %202, %206 : vector<16x1xi1>
    %c176 = arith.constant 176 : index
    %c0_75 = arith.constant 0 : index
    %208 = vector.load %arg3[%c176, %c0_75] : memref<264x64xf32, #tpu.memory_space<vmem>>, vector<1x32xf32>
    %209 = vector.broadcast %208 : vector<1x32xf32> to vector<16x32xf32>
    %210 = arith.mulf %198, %209 : vector<16x32xf32>
    %cst_76 = arith.constant 0.000000e+00 : f32
    %211 = vector.shape_cast %207 : vector<16x1xi1> to vector<16x1xi1>
    %212 = vector.broadcast %211 : vector<16x1xi1> to vector<16x32xi1>
    %213 = vector.broadcast %cst_76 : f32 to vector<16x32xf32>
    %214 = arith.select %212, %210, %213 : vector<16x32xi1>, vector<16x32xf32>
    %215 = arith.addf %197, %214 : vector<16x32xf32>
    %c184 = arith.constant 184 : index
    %c0_77 = arith.constant 0 : index
    %216 = vector.load %arg3[%c184, %c0_77] : memref<264x64xf32, #tpu.memory_space<vmem>>, vector<1x32xf32>
    %217 = vector.broadcast %216 : vector<1x32xf32> to vector<16x32xf32>
    %218 = arith.addf %215, %217 : vector<16x32xf32>
    %cst_78 = arith.constant 0.000000e+00 : f32
    %219 = vector.broadcast %cst_78 : f32 to vector<16x32xf32>
    %220 = arith.subf %219, %218 : vector<16x32xf32>
    %221 = math.exp %220 : vector<16x32xf32>
    %cst_79 = arith.constant 1.000000e+00 : f32
    %222 = vector.broadcast %cst_79 : f32 to vector<16x32xf32>
    %223 = arith.addf %222, %221 : vector<16x32xf32>
    %cst_80 = arith.constant 1.000000e+00 : f32
    %224 = vector.broadcast %cst_80 : f32 to vector<16x32xf32>
    %225 = arith.divf %224, %223 : vector<16x32xf32>
    %226 = arith.mulf %218, %225 : vector<16x32xf32>
    %227 = arith.truncf %226 : vector<16x32xf32> to vector<16x32xbf16>
    %c384 = arith.constant 384 : index
    %c0_81 = arith.constant 0 : index
    %228 = vector.load %arg2[%c384, %c0_81] : memref<416x64xbf16, #tpu.memory_space<vmem>>, vector<32x32xbf16>
    %cst_82 = arith.constant dense<0.000000e+00> : vector<16x32xf32>
    %229 = tpu.matmul %227, %228, %cst_82 {dimension_numbers = #tpu.dot_dimension_numbers<[1], [0], [0], [1], [0, 0, 1, 1], [], []>} : vector<16x32xbf16>, vector<32x32xbf16>, vector<16x32xf32> -> vector<16x32xf32>
    %230 = arith.addf %116, %229 : vector<16x32xf32>
    %c192 = arith.constant 192 : index
    %c0_83 = arith.constant 0 : index
    %231 = vector.load %arg3[%c192, %c0_83] : memref<264x64xf32, #tpu.memory_space<vmem>>, vector<1x32xf32>
    %232 = vector.broadcast %231 : vector<1x32xf32> to vector<16x32xf32>
    %233 = arith.addf %230, %232 : vector<16x32xf32>
    %cst_84 = arith.constant dense<0.000000e+00> : vector<16xf32>
    %234 = vector.multi_reduction <add>, %233, %cst_84 [1] : vector<16x32xf32> to vector<16xf32>
    %235 = vector.shape_cast %234 : vector<16xf32> to vector<16x1xf32>
    %cst_85 = arith.constant 3.200000e+01 : f32
    %236 = vector.broadcast %cst_85 : f32 to vector<16x1xf32>
    %237 = arith.divf %235, %236 : vector<16x1xf32>
    %238 = vector.broadcast %237 : vector<16x1xf32> to vector<16x32xf32>
    %239 = arith.subf %233, %238 : vector<16x32xf32>
    %240 = arith.mulf %239, %239 : vector<16x32xf32>
    %cst_86 = arith.constant dense<0.000000e+00> : vector<16xf32>
    %241 = vector.multi_reduction <add>, %240, %cst_86 [1] : vector<16x32xf32> to vector<16xf32>
    %242 = vector.shape_cast %241 : vector<16xf32> to vector<16x1xf32>
    %cst_87 = arith.constant 3.200000e+01 : f32
    %243 = vector.broadcast %cst_87 : f32 to vector<16x1xf32>
    %244 = arith.divf %242, %243 : vector<16x1xf32>
    %245 = vector.broadcast %237 : vector<16x1xf32> to vector<16x32xf32>
    %246 = arith.subf %233, %245 : vector<16x32xf32>
    %cst_88 = arith.constant 9.99999996E-13 : f32
    %247 = vector.broadcast %cst_88 : f32 to vector<16x1xf32>
    %248 = arith.addf %244, %247 : vector<16x1xf32>
    %249 = math.rsqrt %248 : vector<16x1xf32>
    %250 = vector.broadcast %249 : vector<16x1xf32> to vector<16x32xf32>
    %251 = arith.mulf %246, %250 : vector<16x32xf32>
    %c24 = arith.constant 24 : index
    %c0_89 = arith.constant 0 : index
    %252 = vector.load %arg3[%c24, %c0_89] : memref<264x64xf32, #tpu.memory_space<vmem>>, vector<1x32xf32>
    %253 = vector.broadcast %252 : vector<1x32xf32> to vector<16x32xf32>
    %254 = arith.mulf %251, %253 : vector<16x32xf32>
    %c64_90 = arith.constant 64 : index
    %c0_91 = arith.constant 0 : index
    %255 = vector.load %arg3[%c64_90, %c0_91] : memref<264x64xf32, #tpu.memory_space<vmem>>, vector<1x32xf32>
    %256 = vector.broadcast %255 : vector<1x32xf32> to vector<16x32xf32>
    %257 = arith.addf %254, %256 : vector<16x32xf32>
    %258 = arith.truncf %257 : vector<16x32xf32> to vector<16x32xbf16>
    %c224 = arith.constant 224 : index
    %c0_92 = arith.constant 0 : index
    %259 = vector.load %arg2[%c224, %c0_92] : memref<416x64xbf16, #tpu.memory_space<vmem>>, vector<32x64xbf16>
    %cst_93 = arith.constant dense<0.000000e+00> : vector<16x64xf32>
    %260 = tpu.matmul %258, %259, %cst_93 {dimension_numbers = #tpu.dot_dimension_numbers<[1], [0], [0], [1], [0, 0, 1, 1], [], []>} : vector<16x32xbf16>, vector<32x64xbf16>, vector<16x64xf32> -> vector<16x64xf32>
    %c128_94 = arith.constant 128 : index
    %c0_95 = arith.constant 0 : index
    %261 = vector.load %arg3[%c128_94, %c0_95] : memref<264x64xf32, #tpu.memory_space<vmem>>, vector<1x64xf32>
    %262 = vector.broadcast %261 : vector<1x64xf32> to vector<16x64xf32>
    %263 = arith.addf %260, %262 : vector<16x64xf32>
    %cst_96 = arith.constant 0.000000e+00 : f32
    %264 = vector.broadcast %cst_96 : f32 to vector<16x64xf32>
    %265 = arith.maximumf %263, %264 : vector<16x64xf32>
    %266 = arith.truncf %265 : vector<16x64xf32> to vector<16x64xbf16>
    %c256 = arith.constant 256 : index
    %c0_97 = arith.constant 0 : index
    %267 = vector.load %arg2[%c256, %c0_97] : memref<416x64xbf16, #tpu.memory_space<vmem>>, vector<64x32xbf16>
    %cst_98 = arith.constant dense<0.000000e+00> : vector<16x32xf32>
    %268 = tpu.matmul %266, %267, %cst_98 {dimension_numbers = #tpu.dot_dimension_numbers<[1], [0], [0], [1], [0, 0, 1, 1], [], []>} : vector<16x64xbf16>, vector<64x32xbf16>, vector<16x32xf32> -> vector<16x32xf32>
    %c136 = arith.constant 136 : index
    %c0_99 = arith.constant 0 : index
    %269 = vector.load %arg3[%c136, %c0_99] : memref<264x64xf32, #tpu.memory_space<vmem>>, vector<1x32xf32>
    %270 = vector.broadcast %269 : vector<1x32xf32> to vector<16x32xf32>
    %271 = arith.addf %268, %270 : vector<16x32xf32>
    %cst_100 = arith.constant 5.000000e-01 : f32
    %272 = vector.broadcast %cst_100 : f32 to vector<16x32xf32>
    %273 = arith.mulf %272, %271 : vector<16x32xf32>
    %274 = arith.addf %233, %273 : vector<16x32xf32>
    %cst_101 = arith.constant dense<0.000000e+00> : vector<16xf32>
    %275 = vector.multi_reduction <add>, %274, %cst_101 [1] : vector<16x32xf32> to vector<16xf32>
    %276 = vector.shape_cast %275 : vector<16xf32> to vector<16x1xf32>
    %cst_102 = arith.constant 3.200000e+01 : f32
    %277 = vector.broadcast %cst_102 : f32 to vector<16x1xf32>
    %278 = arith.divf %276, %277 : vector<16x1xf32>
    %279 = vector.broadcast %278 : vector<16x1xf32> to vector<16x32xf32>
    %280 = arith.subf %274, %279 : vector<16x32xf32>
    %281 = arith.mulf %280, %280 : vector<16x32xf32>
    %cst_103 = arith.constant dense<0.000000e+00> : vector<16xf32>
    %282 = vector.multi_reduction <add>, %281, %cst_103 [1] : vector<16x32xf32> to vector<16xf32>
    %283 = vector.shape_cast %282 : vector<16xf32> to vector<16x1xf32>
    %cst_104 = arith.constant 3.200000e+01 : f32
    %284 = vector.broadcast %cst_104 : f32 to vector<16x1xf32>
    %285 = arith.divf %283, %284 : vector<16x1xf32>
    %286 = vector.broadcast %278 : vector<16x1xf32> to vector<16x32xf32>
    %287 = arith.subf %274, %286 : vector<16x32xf32>
    %cst_105 = arith.constant 9.99999996E-13 : f32
    %288 = vector.broadcast %cst_105 : f32 to vector<16x1xf32>
    %289 = arith.addf %285, %288 : vector<16x1xf32>
    %290 = math.rsqrt %289 : vector<16x1xf32>
    %291 = vector.broadcast %290 : vector<16x1xf32> to vector<16x32xf32>
    %292 = arith.mulf %287, %291 : vector<16x32xf32>
    %c32_106 = arith.constant 32 : index
    %c0_107 = arith.constant 0 : index
    %293 = vector.load %arg3[%c32_106, %c0_107] : memref<264x64xf32, #tpu.memory_space<vmem>>, vector<1x32xf32>
    %294 = vector.broadcast %293 : vector<1x32xf32> to vector<16x32xf32>
    %295 = arith.mulf %292, %294 : vector<16x32xf32>
    %c72 = arith.constant 72 : index
    %c0_108 = arith.constant 0 : index
    %296 = vector.load %arg3[%c72, %c0_108] : memref<264x64xf32, #tpu.memory_space<vmem>>, vector<1x32xf32>
    %297 = vector.broadcast %296 : vector<1x32xf32> to vector<16x32xf32>
    %298 = arith.addf %295, %297 : vector<16x32xf32>
    %c0_109 = arith.constant 0 : index
    %c0_110 = arith.constant 0 : index
    %299 = vector.load %arg4[%c0_109, %c0_110] : memref<16x32xf32, #tpu.memory_space<vmem>>, vector<16x32xf32>
    tpu.vector_store %arg4[%c0_109, %c0_110], %298 {strides = array<i32>} : memref<16x32xf32, #tpu.memory_space<vmem>>, vector<16x32xf32>,
    return
  }
}

</mosaic_0001>

<bundles_post_ra>
// kernel: encoder_layer.1
= control target key start
LH: loop header
LB: loop body
LE: loop exit
PB: predicated region body
PF: predicated region fallthrough
CT: control target
= control target key end

     0   :  { %vm29_vm0 = vcmask 261120   ;;  %s2201_s0 = inlined_call_operand.vmem [shape: f32[16,32], index: 0, kind: input, shape index: {}]   ;;  %s2202_s1 = inlined_call_operand.vmem [shape: f32[64,16], index: 1, kind: input, shape index: {}]   ;;  %s2203_s2 = inlined_call_operand.vmem [shape: bf16[416,64], index: 2, kind: input, shape index: {}]   ;;  %s2204_s3 = inlined_call_operand.vmem [shape: f32[264,64], index: 3, kind: input, shape index: {}]   ;;  %s2205_s4 = inlined_call_operand.hbm [shape: f32[16,32], index: 4, kind: output, shape index: {}]  }
   0x1   :  { %v1815_v0 = vld [vmem:[%s2201_s0] sm:$0xff]  ;;  %v1820_v1 = vld [vmem:[%s2201_s0 + $0x8] sm:$0xff] }
   0x2   :  { %v30_v2 = vsel %vm29_vm0, %v1815_v0, 0.0  ;;  %v33_v3 = vsel %vm29_vm0, %v1820_v1, 0.0 }
   0x3   :  { %31 = vadd.xlane.f32.xlu0 %v30_v2 }
   0x7   :  { %34 = vadd.xlane.f32.xlu0 %v33_v3 }
   0x8   :  { %9 = vsyncpa [#allocation3], 0  ;;  %v1666_v14 = vld [vmem:[%s2203_s2 + $0x48] sm:$0xff]   ;;  %v1782_v15 = vmov 0.0   ;;  %vm1783_vm1 = vmmov 0   ;;  %v1667_v16 = vld [vmem:[%s2203_s2 + $0x40] sm:$0xff]  }
   0x9   :  { %1544 = vmatprep.subr.bf16.mxu0 %v1782_v15  ;;  %1548 = vmatprep.mubr.msk.bf16.mxu0 %vm1783_vm1, %v1782_v15  ;;  %v1668_v17 = vld [vmem:[%s2203_s2 + $0x68] sm:$0xff]   ;;  %v1427_v26 = vld [vmem:[%s2204_s3] ss:$0 sm:$0xff]  ;;  %v1670_v36 = vld [vmem:[%s2203_s2 + $0x58] sm:$0xff]   ;;  %vm177_vm2 = vcmask 523264   ;;  %vm557_vm3 = vcmask 130048  }
   0xa   :  { %1545 = vmatpush3.bf16.msra.mxu0 %v1666_v14  ;;  %1552 = vmatprep.subr.bf16.mxu1 %v1782_v15  ;;  %v1428_v30 = vld [vmem:[%s2204_s3 + $0x28] ss:$0 sm:$0xff]  ;;  %v1669_v35 = vld [vmem:[%s2203_s2 + $0x60] sm:$0xff]   ;;  %v1671_v37 = vld [vmem:[%s2203_s2 + $0x50] sm:$0xff]   ;;  %s1784_s14 = smov [#allocation2]  }
   0xb   :  { %1546 = vmatprep.subr.bf16.mxu0 %v1782_v15  ;;  %1560 = vmatprep.mubr.msk.bf16.mxu1 %vm1783_vm1, %v1782_v15  ;;  %v1429_v38 = vld [vmem:[%s2204_s3 + $0x70] ss:$0 sm:$0xff]  ;;  %v1433_v48 = vld [vmem:[%s2204_s3 + $0x78] ss:$0 sm:$0xff]  ;;  %s1416_s15 = sshll.u32 %s1784_s14, 4  ;;  %s1417_s15 = int_to_ptr.vmem [resolvable:$true] %s1416_s15 }
   0xc   :  { %1553 = vmatpush3.bf16.msra.mxu1 %v1668_v17  ;;  %s1760_s16 = scalar_lea.vmem %s1417_s15, 256  ;;  %p1765_p1 = scmp.lt.s32.totalorder %s1417_s15, %s1417_s15 }
   0xd   :  { %1554 = vmatprep.subr.bf16.mxu1 %v1782_v15  ;;  %p1761_p0 = scmp.ne.s32.totalorder %s1417_s15, %s1760_s16  ;;  %p1766_p2 = scmp.lt.s32.totalorder %s1760_s16, %s1760_s16 }
   0xe   :  { %1547 = vmatpush3.bf16.msra.mxu0 %v1667_v16 }
   0xf   :  { %1564 = vmatprep.subr.bf16.mxu0 %v1782_v15  ;;  %p1767_p3 = por %p1766_p2, %p1765_p1 }
  0x10   :  { %1555 = vmatpush3.bf16.msra.mxu1 %v1669_v35 }
  0x11   :  { %1556 = vmatprep.subr.bf16.mxu1 %v1782_v15  ;;  %p1768_p4 = pnand %p1767_p3, %p1761_p0 }
  0x14   :  { %1557 = vmatpush3.bf16.msra.mxu1 %v1670_v36 }
  0x15   :  { %1558 = vmatprep.subr.bf16.mxu1 %v1782_v15 }
  0x18   :  { %1559 = vmatpush3.bf16.msra.mxu1 %v1671_v37  ;;  %v1449_v37 = vld [vmem:[%s2204_s3 + $0x60] ss:$0 sm:$0xff] }
  0x19   :  { %1580 = vmatprep.subr.bf16.mxu1 %v1782_v15 }
  0x8c   :  { %v32_v4 = vpop.xlane.xlu0 %31 }
  0x8d   :  { %v37_v5 = vmul.f32 0.03125, %v32_v4 }
  0x8f   :  { %v39_v6 = vsub.f32 %v1815_v0, %v37_v5 }
  0x90   :  { %v35_v7 = vpop.xlane.xlu0 %34 }
  0x91   :  { %v38_v8 = vmul.f32 0.03125, %v35_v7  ;;  %v41_v9 = vmul.f32 %v39_v6, %v39_v6  ;;  %v1672_v7 = vld [vmem:[%s2203_s2 + $0x8] sm:$0xff]  }
  0x93   :  { %v40_v10 = vsub.f32 %v1820_v1, %v38_v8  ;;  %v43_v11 = vsel %vm29_vm0, %v41_v9, 0.0  ;;  %v1673_v8 = vld [vmem:[%s2203_s2 + $0x28] sm:$0xff]   ;;  %v1674_v9 = vld [vmem:[%s2203_s2] sm:$0xff]  }
  0x94   :  { %44 = vadd.xlane.f32.xlu1 %v43_v11 }
  0x95   :  { %v42_v12 = vmul.f32 %v40_v10, %v40_v10 }
  0x97   :  { %v46_v13 = vsel %vm29_vm0, %v42_v12, 0.0 }
  0x98   :  { %47 = vadd.xlane.f32.xlu1 %v46_v13 }
 0x11d   :  { %v45_v18 = vpop.xlane.xlu1 %44 }
 0x11e   :  { %v49_v19 = vmul.f32 0.03125, %v45_v18 }
 0x120   :  { %v51_v20 = vadd.f32 1e-12, %v49_v19 }
 0x121   :  { %v48_v21 = vpop.xlane.xlu1 %47 }
 0x122   :  { %1692 = vrsqrt.f32 %v51_v20  ;;  %v50_v22 = vmul.f32 0.03125, %v48_v21  ;;  %v1439_v20 = vld [vmem:[%s2204_s3 + $0x8] ss:$0 sm:$0xff] }
 0x124   :  { %v52_v23 = vadd.f32 1e-12, %v50_v22 }
 0x126   :  { %1694 = vrsqrt.f32 %v52_v23 }
 0x12f   :  { %v1693_v24 = vpop.eup %1692 }
 0x130   :  { %v55_v25 = vmul.f32 %v1693_v24, %v39_v6  ;;  %v1440_v24 = vld [vmem:[%s2204_s3 + $0x30] ss:$0 sm:$0xff] }
 0x132   :  { %v62_v29 = vmul.f32 %v1427_v26, %v55_v25 }
 0x133   :  { %v1695_v27 = vpop.eup %1694 }
 0x134   :  { %v56_v28 = vmul.f32 %v1695_v27, %v40_v10  ;;  %v69_v32 = vadd.f32 %v1428_v30, %v62_v29  ;;  %v1675_v10 = vld [vmem:[%s2203_s2 + $0x20] sm:$0xff]  }
 0x136   :  { %v63_v31 = vmul.f32 %v1427_v26, %v56_v28  ;;  %v1676_v28 = vld [vmem:[%s2203_s2 + $0x18] sm:$0xff]  }
 0x138   :  { %v70_v33 = vadd.f32 %v1428_v30, %v63_v31  ;;  %v1677_v30 = vld [vmem:[%s2203_s2 + $0x10] sm:$0xff]  }
 0x139   :  { %v1441_v31 = vld [vmem:[%s2204_s3 + $0x50] ss:$0 sm:$0xff] }
 0x13a   :  { %v71_v34 = vpack.c.bf16 %v70_v33, %v69_v32 }
 0x13c   :  { %1549 = vmatmul.mubr.msk.bf16.vlgmr.msra.gmra.mxu0 %vm29_vm0, %v71_v34 }
 0x13d   :  { %1568 = vmatprep.mubr.msk.bf16.mxu0 %vm1783_vm1, %v1782_v15  ;;  %1565 = vmatpush3.bf16.msra.mxu0 %v1672_v7  ;;  %v1978_v7 = vld [vmem:[%s2204_s3 + $0x100] sm:$0xff] }
 0x13e   :  { %1566 = vmatprep.subr.bf16.mxu0 %v1782_v15 }
 0x141   :  { %1567 = vmatpush3.bf16.msra.mxu0 %v1674_v9  ;;  %v1984_v9 = vld [vmem:[%s2204_s3 + $0xf8] sm:$0xff] }
 0x142   :  { %1572 = vmatprep.subr.bf16.mxu0 %v1782_v15 }
 0x1fc   :  { %v130_v39 = vpop.f32.mrf.mxu0 }
 0x1fd   :  { %v131_v41 = vadd.f32 %v1429_v38, %v130_v39 }
 0x1fe   :  { %v1550_v40 = vpop.f32.mrf.mxu0 }
 0x1ff   :  { %v137_v45 = vmax.f32 %v131_v41, 0.0  ;;  %v1939_v40 = vld [vmem:[%s2204_s3 + $0xd0] sm:$0xff] }
 0x200   :  { %v133_v42 = vpop.f32.mrf.mxu0 }
 0x201   :  { %v134_v43 = vadd.f32 %v1429_v38, %v133_v42  ;;  %v1934_v38 = vld [vmem:[%s2204_s3 + $0xc8] sm:$0xff] }
 0x202   :  { %v1551_v44 = vpop.f32.mrf.mxu0 }
 0x203   :  { %v138_v46 = vmax.f32 %v134_v43, 0.0 }
 0x205   :  { %v139_v47 = vpack.c.bf16 %v138_v46, %v137_v45 }
 0x207   :  { %1561 = vmatmul.mubr.msk.bf16.vlgmr.msra.gmra.mxu1 %vm177_vm2, %v139_v47 }
 0x208   :  { %1584 = vmatprep.mubr.msk.bf16.mxu1 %vm1783_vm1, %v1782_v15  ;;  %1581 = vmatpush3.bf16.msra.mxu1 %v1673_v8 }
 0x209   :  { %1582 = vmatprep.subr.bf16.mxu1 %v1782_v15 }
 0x20c   :  { %1583 = vmatpush3.bf16.msra.mxu1 %v1675_v10 }
 0x2c7   :  { %v215_v49 = vpop.f32.mrf.mxu1 }
 0x2c8   :  { %v216_v50 = vadd.f32 %v1433_v48, %v215_v49 }
 0x2c9   :  { %v1562_v51 = vpop.f32.mrf.mxu1 }
 0x2ca   :  { %v222_v52 = vmul.f32 0.5, %v216_v50 }
 0x2cb   :  { %v218_v53 = vpop.f32.mrf.mxu1 }
 0x2cc   :  { %v1879_v54 = vadd.f32 %v222_v52, %v1815_v0  ;;  %v219_v55 = vadd.f32 %v1433_v48, %v218_v53  ;;  %v1445_v52 = vld [vmem:[%s2204_s3 + $0x58] ss:$0 sm:$0xff] }
 0x2cd   :  { %v1563_v56 = vpop.f32.mrf.mxu1 }
 0x2ce   :  { %v223_v57 = vmul.f32 0.5, %v219_v55  ;;  %v226_v58 = vsel %vm29_vm0, %v1879_v54, 0.0 }
 0x2cf   :  { %227 = vadd.xlane.f32.xlu0 %v226_v58 }
 0x2d0   :  { %v1884_v59 = vadd.f32 %v223_v57, %v1820_v1 }
 0x2d2   :  { %v229_v60 = vsel %vm29_vm0, %v1884_v59, 0.0 }
 0x2d3   :  { %230 = vadd.xlane.f32.xlu1 %v229_v60 }
 0x358   :  { %v228_v61 = vpop.xlane.xlu0 %227 }
 0x359   :  { %v232_v62 = vmul.f32 0.03125, %v228_v61  ;;  %v1951_v61 = vld [vmem:[%s2204_s3 + $0xe0] sm:$0xff] }
 0x35b   :  { %v234_v63 = vsub.f32 %v1879_v54, %v232_v62  ;;  %v1956_v62 = vld [vmem:[%s2204_s3 + $0xf0] sm:$0xff] }
 0x35c   :  { %v231_v0 = vpop.xlane.xlu1 %230 }
 0x35d   :  { %v233_v2 = vmul.f32 0.03125, %v231_v0  ;;  %v236_v3 = vmul.f32 %v234_v63, %v234_v63  ;;  %v1963_v0 = vld [vmem:[%s2204_s3 + $0xd8] sm:$0xff] }
 0x35f   :  { %v235_v4 = vsub.f32 %v1884_v59, %v233_v2  ;;  %v238_v5 = vsel %vm29_vm0, %v236_v3, 0.0  ;;  %v1968_v2 = vld [vmem:[%s2204_s3 + $0xe8] sm:$0xff] }
 0x360   :  { %239 = vadd.xlane.f32.xlu0 %v238_v5 }
 0x361   :  { %v237_v6 = vmul.f32 %v235_v4, %v235_v4 }
 0x363   :  { %v241_v1 = vsel %vm29_vm0, %v237_v6, 0.0 }
 0x364   :  { %242 = vadd.xlane.f32.xlu1 %v241_v1 }
 0x3e9   :  { %v240_v11 = vpop.xlane.xlu0 %239 }
 0x3ea   :  { %v244_v12 = vmul.f32 0.03125, %v240_v11 }
 0x3ec   :  { %v246_v13 = vadd.f32 1e-12, %v244_v12 }
 0x3ed   :  { %v243_v14 = vpop.xlane.xlu1 %242 }
 0x3ee   :  { %1696 = vrsqrt.f32 %v246_v13  ;;  %v245_v16 = vmul.f32 0.03125, %v243_v14  ;;  %v21_v14 = vld [vmem:[%s2202_s1] sm:$0xff] }
 0x3f0   :  { %v247_v17 = vadd.f32 1e-12, %v245_v16  ;;  %v23_v16 = vld [vmem:[%s2202_s1 + $0x10] sm:$0xff] }
 0x3f2   :  { %1698 = vrsqrt.f32 %v247_v17 }
 0x3fb   :  { %v1697_v18 = vpop.eup %1696 }
 0x3fc   :  { %v250_v19 = vmul.f32 %v1697_v18, %v234_v63 }
 0x3fe   :  { %v257_v23 = vmul.f32 %v1439_v20, %v250_v19 }
 0x3ff   :  { %v1699_v21 = vpop.eup %1698 }
 0x400   :  { %v251_v22 = vmul.f32 %v1699_v21, %v235_v4  ;;  %v264_v26 = vadd.f32 %v1440_v24, %v257_v23  ;;  %v24_v23 = vld [vmem:[%s2202_s1 + $0x18] sm:$0xff] }
 0x402   :  { %v258_v25 = vmul.f32 %v1439_v20, %v251_v22  ;;  %v22_v20 = vld [vmem:[%s2202_s1 + $0x8] sm:$0xff] }
 0x404   :  { %v265_v27 = vadd.f32 %v1440_v24, %v258_v25 }
 0x406   :  { %v266_v29 = vpack.c.bf16 %v265_v27, %v264_v26  ;;  %v25_v27 = vld [vmem:[%s2202_s1 + $0x20] sm:$0xff] }
 0x408   :  { %1569 = vmatmul.mubr.msk.bf16.vlgmr.msra.gmra.mxu0 %vm29_vm0, %v266_v29  ;;  %1585 = vmatmul.mubr.msk.bf16.vlgmr.msra.gmra.mxu1 %vm29_vm0, %v266_v29 }
 0x409   :  { %1573 = vmatpush3.bf16.msra.mxu0 %v1676_v28  ;;  %1576 = vmatprep.mubr.msk.bf16.mxu0 %vm1783_vm1, %v1782_v15 }
 0x40a   :  { %1574 = vmatprep.subr.bf16.mxu0 %v1782_v15 }
 0x40d   :  { %1575 = vmatpush3.bf16.msra.mxu0 %v1677_v30 }
 0x410   :  { %1577 = vmatmul.mubr.msk.bf16.vlgmr.msra.gmra.mxu0 %vm29_vm0, %v266_v29 }
 0x4c8   :  { %v325_v32 = vpop.f32.mrf.mxu0  ;;  %v449_v33 = vpop.f32.mrf.mxu1 }
 0x4c9   :  { %v326_v36 = vadd.f32 %v1441_v31, %v325_v32  ;;  %v450_v44 = vadd.f32 %v1449_v37, %v449_v33 }
 0x4ca   :  { %v1570_v34 = vpop.f32.mrf.mxu0  ;;  %v1586_v35 = vpop.f32.mrf.mxu1 }
 0x4cb   :  { %v464_v47 = vmul.f32 %v1934_v38, %v326_v36  ;;  %v466_v5 = vmul.f32 %v1963_v0, %v326_v36  ;;  %v468_v6 = vmul.f32 %v1968_v2, %v326_v36  ;;  %v470_v11 = vmul.f32 %v1984_v9, %v326_v36  ;;  %v26_v35 = vld [vmem:[%s2202_s1 + $0x28] sm:$0xff] }
 0x4cc   :  { %v328_v39 = vpop.f32.mrf.mxu0  ;;  %v452_v41 = vpop.f32.mrf.mxu1 }
 0x4cd   :  { %v329_v42 = vadd.f32 %v1441_v31, %v328_v39  ;;  %v453_v43 = vadd.f32 %v1449_v37, %v452_v41  ;;  %v27_v31 = vld [vmem:[%s2202_s1 + $0x30] sm:$0xff]  ;;  %v28_v41 = vld [vmem:[%s2202_s1 + $0x38] sm:$0xff] }
 0x4ce   :  { %v1571_v45 = vpop.f32.mrf.mxu0  ;;  %v1587_v46 = vpop.f32.mrf.mxu1 }
 0x4cf   :  { %v465_v48 = vmul.f32 %v1939_v40, %v329_v42  ;;  %v650_v49 = vpack.c.bf16 %v453_v43, %v450_v44  ;;  %v467_v3 = vmul.f32 %v1951_v61, %v329_v42  ;;  %v469_v4 = vmul.f32 %v1956_v62, %v329_v42 }
 0x4d0   :  { %v387_v50 = vpop.f32.mrf.mxu0  ;;  %v471_v10 = vmul.f32 %v1978_v7, %v329_v42 }
 0x4d1   :  { %v472_v51 = vpack.c.bf16 %v465_v48, %v464_v47  ;;  %1598 = vmatprep.subr.bf16.mxu1 %v650_v49  ;;  %v388_v56 = vadd.f32 %v1445_v52, %v387_v50  ;;  %v473_v1 = vpack.c.bf16 %v467_v3, %v466_v5  ;;  %v474_v8 = vpack.c.bf16 %v469_v4, %v468_v6 }
 0x4d2   :  { %v1578_v53 = vpop.f32.mrf.mxu0  ;;  %1599 = vmatpush3.bf16.msra.mxu1 %v650_v49  ;;  %v475_v12 = vpack.c.bf16 %v471_v10, %v470_v11 }
 0x4d3   :  { %1590 = vmatprep.mubr.msk.bf16.mxu0 %vm29_vm0, %v472_v51  ;;  %1616 = vmatprep.subr.bf16.mxu1 %v1782_v15 }
 0x4d4   :  { %v390_v55 = vpop.f32.mrf.mxu0 }
 0x4d5   :  { %v391_v57 = vadd.f32 %v1445_v52, %v390_v55 }
 0x4d6   :  { %v1579_v58 = vpop.f32.mrf.mxu0 }
 0x4d7   :  { %v476_v60 = vpack.c.bf16 %v391_v57, %v388_v56 }
 0x4d9   :  { %1660 = vmatprep.subr.msk.bf16.mxu0 %vm29_vm0, %v476_v60  ;;  %v490_v63 = vsel %vm29_vm0, %v476_v60, 0 }
 0x4da   :  { %1589 = vmatpush3.bf16.xpose.msra.mxu0 %v490_v63 }
 0x4db   :  { %1608 = vmatprep.subr.bf16.mxu0 %v1782_v15 }
 0x4e1   :  { %1591 = vmatmul.mubr.msk.bf16.vlgmr.msra.gmra.mxu0 %vm29_vm0, %v473_v1 }
 0x4e2   :  { %1594 = vmatprep.mubr.msk.bf16.mxu0 %vm29_vm0, %v474_v8 }
 0x4e9   :  { %1595 = vmatmul.mubr.msk.bf16.gmra.mxu0 %vm29_vm0, %v475_v12 }
 0x4ea   :  { %1612 = vmatprep.mubr.msk.bf16.mxu0 %vm1783_vm1, %v1782_v15 }
 0x5a1   :  { %v1592_v13 = vpop.f32.mrf.mxu0 }
 0x5a2   :  { %v535_v21 = vadd.f32 %v1592_v13, %v23_v16 }
 0x5a3   :  { %v526_v17 = vpop.f32.mrf.mxu0 }
 0x5a4   :  { %v527_v18 = vadd.f32 %v526_v17, %v21_v14  ;;  %v564_v30 = vsel %vm557_vm3, %v535_v21, -inf }
 0x5a5   :  { %v1593_v19 = vpop.f32.mrf.mxu0 }
 0x5a6   :  { %v558_v22 = vsel %vm557_vm3, %v527_v18, -inf  ;;  %v538_v28 = vadd.f32 %v1593_v19, %v24_v23 }
 0x5a7   :  { %v529_v24 = vpop.f32.mrf.mxu0  ;;  %559 = vmax.xlane.f32.xlu0 %v558_v22 }
 0x5a8   :  { %v530_v25 = vadd.f32 %v529_v24, %v22_v20  ;;  %v567_v37 = vsel %vm557_vm3, %v538_v28, -inf }
 0x5a9   :  { %v1596_v26 = vpop.f32.mrf.mxu0 }
 0x5aa   :  { %v561_v29 = vsel %vm557_vm3, %v530_v25, -inf  ;;  %v551_v36 = vadd.f32 %v1596_v26, %v27_v31 }
 0x5ab   :  { %v542_v32 = vpop.f32.mrf.mxu0  ;;  %562 = vmax.xlane.f32.xlu1 %v561_v29  ;;  %565 = vmax.xlane.f32.xlu0 %v564_v30 }
 0x5ac   :  { %v543_v33 = vadd.f32 %v542_v32, %v25_v27  ;;  %v576_v46 = vsel %vm557_vm3, %v551_v36, -inf }
 0x5ad   :  { %v1597_v34 = vpop.f32.mrf.mxu0 }
 0x5ae   :  { %v570_v39 = vsel %vm557_vm3, %v543_v33, -inf  ;;  %v554_v44 = vadd.f32 %v1597_v34, %v28_v41 }
 0x5af   :  { %v545_v42 = vpop.f32.mrf.mxu0  ;;  %568 = vmax.xlane.f32.xlu1 %v567_v37  ;;  %571 = vmax.xlane.f32.xlu0 %v570_v39 }
 0x5b0   :  { %v546_v43 = vadd.f32 %v545_v42, %v26_v35  ;;  %v579_v47 = vsel %vm557_vm3, %v554_v44, -inf }
 0x5b2   :  { %v573_v45 = vsel %vm557_vm3, %v546_v43, -inf }
 0x5b3   :  { %574 = vmax.xlane.f32.xlu1 %v573_v45  ;;  %577 = vmax.xlane.f32.xlu0 %v576_v46 }
 0x5b7   :  { %580 = vmax.xlane.f32.xlu1 %v579_v47 }
 0x630   :  { %v560_v48 = vpop.xlane.xlu0 %559 }
 0x631   :  { %v582_v49 = vsub.f32 %v527_v18, %v560_v48 }
 0x633   :  { %v590_v50 = vmul.f32 1.442695, %v582_v49 }
 0x634   :  { %v563_v51 = vpop.xlane.xlu1 %562  ;;  %v566_v52 = vpop.xlane.xlu0 %565 }
 0x635   :  { %1700 = vpow2.f32 %v590_v50  ;;  %v583_v53 = vsub.f32 %v530_v25, %v563_v51  ;;  %v584_v55 = vsub.f32 %v535_v21, %v566_v52 }
 0x637   :  { %v592_v56 = vmul.f32 1.442695, %v583_v53  ;;  %v594_v57 = vmul.f32 1.442695, %v584_v55 }
 0x638   :  { %v569_v58 = vpop.xlane.xlu1 %568  ;;  %v572_v60 = vpop.xlane.xlu0 %571 }
 0x639   :  { %1702 = vpow2.f32 %v592_v56  ;;  %v585_v63 = vsub.f32 %v538_v28, %v569_v58  ;;  %v586_v3 = vsub.f32 %v543_v33, %v572_v60 }
 0x63a   :  { %1704 = vpow2.f32 %v594_v57 }
 0x63b   :  { %v596_v4 = vmul.f32 1.442695, %v585_v63  ;;  %v598_v5 = vmul.f32 1.442695, %v586_v3 }
 0x63c   :  { %v575_v6 = vpop.xlane.xlu1 %574  ;;  %v578_v1 = vpop.xlane.xlu0 %577 }
 0x63d   :  { %1706 = vpow2.f32 %v596_v4  ;;  %v587_v8 = vsub.f32 %v546_v43, %v575_v6  ;;  %v588_v10 = vsub.f32 %v551_v36, %v578_v1  ;;  %v1678_v6 = vld [vmem:[%s2203_s2 + $0x38] sm:$0xff]   ;;  %v1679_v1 = vld [vmem:[%s2203_s2 + $0x30] sm:$0xff]  }
 0x63e   :  { %1708 = vpow2.f32 %v598_v5  ;;  %1609 = vmatpush3.bf16.msra.mxu0 %v1678_v6 }
 0x63f   :  { %v600_v11 = vmul.f32 1.442695, %v587_v8  ;;  %v602_v12 = vmul.f32 1.442695, %v588_v10  ;;  %1610 = vmatprep.subr.bf16.mxu0 %v1782_v15 }
 0x640   :  { %v581_v13 = vpop.xlane.xlu1 %580 }
 0x641   :  { %1710 = vpow2.f32 %v600_v11  ;;  %v589_v14 = vsub.f32 %v554_v44, %v581_v13 }
 0x642   :  { %v1701_v16 = vpop.eup %1700  ;;  %1712 = vpow2.f32 %v602_v12  ;;  %1611 = vmatpush3.bf16.msra.mxu0 %v1679_v1 }
 0x643   :  { %v604_v17 = vmul.f32 1.442695, %v589_v14  ;;  %v606_v18 = vsel %vm557_vm3, %v1701_v16, 0.0  ;;  %1624 = vmatprep.subr.bf16.mxu0 %v1782_v15 }
 0x644   :  { %607 = vadd.xlane.f32.xlu0 %v606_v18 }
 0x645   :  { %1714 = vpow2.f32 %v604_v17 }
 0x646   :  { %v1703_v19 = vpop.eup %1702 }
 0x647   :  { %v1705_v20 = vpop.eup %1704  ;;  %v609_v21 = vsel %vm557_vm3, %v1703_v19, 0.0 }
 0x648   :  { %610 = vadd.xlane.f32.xlu1 %v609_v21  ;;  %v612_v22 = vsel %vm557_vm3, %v1705_v20, 0.0 }
 0x649   :  { %613 = vadd.xlane.f32.xlu0 %v612_v22 }
 0x64a   :  { %v1707_v23 = vpop.eup %1706 }
 0x64b   :  { %v1709_v24 = vpop.eup %1708  ;;  %v615_v25 = vsel %vm557_vm3, %v1707_v23, 0.0 }
 0x64c   :  { %616 = vadd.xlane.f32.xlu1 %v615_v25  ;;  %v618_v26 = vsel %vm557_vm3, %v1709_v24, 0.0 }
 0x64d   :  { %619 = vadd.xlane.f32.xlu0 %v618_v26 }
 0x64e   :  { %v1711_v27 = vpop.eup %1710 }
 0x64f   :  { %v1713_v28 = vpop.eup %1712  ;;  %v621_v29 = vsel %vm557_vm3, %v1711_v27, 0.0 }
 0x650   :  { %622 = vadd.xlane.f32.xlu1 %v621_v29  ;;  %v624_v30 = vsel %vm557_vm3, %v1713_v28, 0.0 }
 0x651   :  { %625 = vadd.xlane.f32.xlu0 %v624_v30 }
 0x652   :  { %v1715_v31 = vpop.eup %1714 }
 0x653   :  { %v627_v32 = vsel %vm557_vm3, %v1715_v31, 0.0 }
 0x654   :  { %628 = vadd.xlane.f32.xlu1 %v627_v32 }
 0x6cd   :  { %v608_v33 = vpop.xlane.xlu0 %607 }
 0x6ce   :  { %1716 = vrcp.f32 %v608_v33 }
 0x6d1   :  { %v611_v34 = vpop.xlane.xlu1 %610 }
 0x6d2   :  { %1718 = vrcp.f32 %v611_v34  ;;  %v614_v35 = vpop.xlane.xlu0 %613 }
 0x6d3   :  { %1720 = vrcp.f32 %v614_v35 }
 0x6d5   :  { %v617_v36 = vpop.xlane.xlu1 %616 }
 0x6d6   :  { %1722 = vrcp.f32 %v617_v36  ;;  %v620_v37 = vpop.xlane.xlu0 %619 }
 0x6d7   :  { %1724 = vrcp.f32 %v620_v37 }
 0x6d9   :  { %v623_v39 = vpop.xlane.xlu1 %622 }
 0x6da   :  { %1726 = vrcp.f32 %v623_v39  ;;  %v626_v41 = vpop.xlane.xlu0 %625 }
 0x6db   :  { %1728 = vrcp.f32 %v626_v41  ;;  %v1717_v42 = vpop.eup %1716 }
 0x6dc   :  { %v631_v45 = vmul.f32 %v1717_v42, %v1701_v16 }
 0x6dd   :  { %v629_v43 = vpop.xlane.xlu1 %628 }
 0x6de   :  { %1730 = vrcp.f32 %v629_v43 }
 0x6df   :  { %v1719_v44 = vpop.eup %1718 }
 0x6e0   :  { %v633_v46 = vmul.f32 %v1719_v44, %v1703_v19  ;;  %v1721_v47 = vpop.eup %1720 }
 0x6e1   :  { %v635_v50 = vmul.f32 %v1721_v47, %v1705_v20  ;;  %v1681_v47 = vld [vmem:[%s2203_s2 + $0xb8] sm:$0xff]  }
 0x6e2   :  { %v646_v48 = vpack.c.bf16 %v633_v46, %v631_v45  ;;  %v1680_v46 = vld [vmem:[%s2203_s2 + $0xa8] sm:$0xff]  }
 0x6e3   :  { %v1723_v49 = vpop.eup %1722 }
 0x6e4   :  { %1600 = vmatprep.mubr.msk.bf16.mxu1 %vm557_vm3, %v646_v48  ;;  %v637_v51 = vmul.f32 %v1723_v49, %v1707_v23  ;;  %v1725_v52 = vpop.eup %1724  ;;  %v1682_v48 = vld [vmem:[%s2203_s2 + $0xa0] sm:$0xff]   ;;  %v1683_v49 = vld [vmem:[%s2203_s2 + $0xb0] sm:$0xff]  }
 0x6e5   :  { %v639_v56 = vmul.f32 %v1725_v52, %v1709_v24 }
 0x6e6   :  { %v647_v53 = vpack.c.bf16 %v637_v51, %v635_v50 }
 0x6e7   :  { %v1727_v55 = vpop.eup %1726 }
 0x6e8   :  { %1601 = vmatmul.mubr.msk.bf16.vlgmr.msra.gmra.mxu1 %vm557_vm3, %v647_v53  ;;  %v641_v57 = vmul.f32 %v1727_v55, %v1711_v27  ;;  %v1729_v58 = vpop.eup %1728 }
 0x6e9   :  { %v643_v3 = vmul.f32 %v1729_v58, %v1713_v28  ;;  %1617 = vmatpush3.bf16.msra.mxu1 %v1680_v46 }
 0x6ea   :  { %v648_v60 = vpack.c.bf16 %v641_v57, %v639_v56  ;;  %1618 = vmatprep.subr.bf16.mxu1 %v1782_v15 }
 0x6eb   :  { %v1731_v63 = vpop.eup %1730 }
 0x6ec   :  { %1604 = vmatprep.mubr.msk.bf16.mxu1 %vm557_vm3, %v648_v60  ;;  %v645_v4 = vmul.f32 %v1731_v63, %v1715_v31  ;;  %v1465_v60 = vld [vmem:[%s2204_s3 + $0x10] ss:$0 sm:$0xff] }
 0x6ed   :  { %1619 = vmatpush3.bf16.msra.mxu1 %v1682_v48  ;;  %v1477_v48 = vld [vmem:[%s2204_s3 + $0xb0] ss:$0 sm:$0xff] }
 0x6ee   :  { %v649_v5 = vpack.c.bf16 %v645_v4, %v643_v3  ;;  %1632 = vmatprep.subr.bf16.mxu1 %v1782_v15 }
 0x6f0   :  { %1605 = vmatmul.mubr.msk.bf16.gmra.mxu1 %vm557_vm3, %v649_v5  ;;  %v1466_v5 = vld [vmem:[%s2204_s3 + $0x38] ss:$0 sm:$0xff] }
 0x6f1   :  { %1620 = vmatprep.mubr.msk.bf16.mxu1 %vm1783_vm1, %v1782_v15 }
 0x7a8   :  { %v1602_v8 = vpop.f32.mrf.mxu1 }
 0x7a9   :  { %v730_v17 = vmul.f32 %v1602_v8, %v1963_v0 }
 0x7aa   :  { %v697_v10 = vpop.f32.mrf.mxu1 }
 0x7ab   :  { %v728_v14 = vmul.f32 %v697_v10, %v1934_v38 }
 0x7ac   :  { %v1603_v11 = vpop.f32.mrf.mxu1 }
 0x7ad   :  { %v736_v21 = vadd.f32 %v730_v17, %v728_v14  ;;  %v731_v22 = vmul.f32 %v1603_v11, %v1951_v61  ;;  %v1464_v61 = vld [vmem:[%s2204_s3 + $0x68] ss:$0 sm:$0xff] }
 0x7ae   :  { %v700_v12 = vpop.f32.mrf.mxu1  ;;  %v1684_v11 = vld [vmem:[%s2203_s2 + $0xc8] sm:$0xff]  }
 0x7af   :  { %v729_v18 = vmul.f32 %v700_v12, %v1939_v40  ;;  %v1685_v12 = vld [vmem:[%s2203_s2 + $0xc0] sm:$0xff]  }
 0x7b0   :  { %v1606_v13 = vpop.f32.mrf.mxu1 }
 0x7b1   :  { %v737_v24 = vadd.f32 %v731_v22, %v729_v18  ;;  %v734_v27 = vmul.f32 %v1606_v13, %v1984_v9  ;;  %v1471_v13 = vld [vmem:[%s2204_s3 + $0x98] ss:$0 sm:$0xff] }
 0x7b2   :  { %v713_v16 = vpop.f32.mrf.mxu1 }
 0x7b3   :  { %v732_v19 = vmul.f32 %v713_v16, %v1968_v2 }
 0x7b4   :  { %v1607_v20 = vpop.f32.mrf.mxu1 }
 0x7b5   :  { %v738_v25 = vadd.f32 %v736_v21, %v732_v19  ;;  %v735_v38 = vmul.f32 %v1607_v20, %v1978_v7 }
 0x7b6   :  { %v716_v23 = vpop.f32.mrf.mxu1 }
 0x7b7   :  { %v733_v26 = vmul.f32 %v716_v23, %v1956_v62  ;;  %v740_v29 = vadd.f32 %v738_v25, %v734_v27 }
 0x7b9   :  { %v739_v28 = vadd.f32 %v737_v24, %v733_v26 }
 0x7bb   :  { %v741_v0 = vadd.f32 %v739_v28, %v735_v38 }
 0x7bd   :  { %v742_v30 = vpack.c.bf16 %v741_v0, %v740_v29 }
 0x7bf   :  { %1613 = vmatmul.mubr.msk.bf16.vlgmr.msra.gmra.mxu0 %vm29_vm0, %v742_v30  ;;  %v994_v30 = vlaneseq }
 0x7c0   :  { %1628 = vmatprep.mubr.msk.bf16.mxu0 %vm1783_vm1, %v1782_v15  ;;  %1625 = vmatpush3.bf16.msra.mxu0 %v1681_v47 }
 0x7c1   :  { %1626 = vmatprep.subr.bf16.mxu0 %v1782_v15 }
 0x7c4   :  { %1627 = vmatpush3.bf16.msra.mxu0 %v1683_v49  ;;  %v1475_v49 = vld [vmem:[%s2204_s3 + $0xa8] ss:$0 sm:$0xff] }
 0x7c5   :  { %1640 = vmatprep.subr.bf16.mxu0 %v1782_v15 }
 0x87f   :  { %v796_v40 = vpop.f32.mrf.mxu0 }
 0x880   :  { %v803_v62 = vadd.f32 %v796_v40, %v1879_v54 }
 0x881   :  { %v1614_v2 = vpop.f32.mrf.mxu0 }
 0x882   :  { %v2061_v9 = vadd.f32 %v1464_v61, %v803_v62  ;;  %v1467_v2 = vld [vmem:[%s2204_s3 + $0x90] ss:$0 sm:$0xff] }
 0x883   :  { %v799_v7 = vpop.f32.mrf.mxu0 }
 0x884   :  { %v804_v31 = vadd.f32 %v799_v7, %v1884_v59  ;;  %v812_v32 = vsel %vm29_vm0, %v2061_v9, 0.0 }
 0x885   :  { %813 = vadd.xlane.f32.xlu0 %v812_v32  ;;  %v1615_v33 = vpop.f32.mrf.mxu0 }
 0x886   :  { %v2066_v34 = vadd.f32 %v1464_v61, %v804_v31  ;;  %v995_v61 = vshrl.u32 %v994_v30, 7 }
 0x888   :  { %v815_v35 = vsel %vm29_vm0, %v2066_v34, 0.0  ;;  %v996_v62 = vadd.s32 8, %v995_v61  ;;  %v1001_v31 = vand.u32 7, %v995_v61  ;;  %vm1030_vm4 = vcmp.lt.s32.totalorder %v995_v61, 1 }
 0x889   :  { %816 = vadd.xlane.f32.xlu1 %v815_v35  ;;  %vm1058_vm5 = vcmp.lt.s32.totalorder %v995_v61, 7 }
 0x88a   :  { %v1008_v32 = vand.u32 7, %v996_v62 }
 0x90e   :  { %v814_v36 = vpop.xlane.xlu0 %813 }
 0x90f   :  { %v818_v37 = vmul.f32 0.03125, %v814_v36 }
 0x911   :  { %v820_v54 = vsub.f32 %v2061_v9, %v818_v37 }
 0x912   :  { %v817_v39 = vpop.xlane.xlu1 %816 }
 0x913   :  { %v819_v41 = vmul.f32 0.03125, %v817_v39  ;;  %v822_v42 = vmul.f32 %v820_v54, %v820_v54  ;;  %v1034_v39 = vadd.s32 4294967295, %v1008_v32 }
 0x915   :  { %v821_v59 = vsub.f32 %v2066_v34, %v819_v41  ;;  %v824_v43 = vsel %vm29_vm0, %v822_v42, 0.0  ;;  %v1476_v42 = vld [vmem:[%s2204_s3 + $0xa0] ss:$0 sm:$0xff]  ;;  %vm1036_vm7 = vcmp.ge.s32.totalorder %v1034_v39, 0 }
 0x916   :  { %825 = vadd.xlane.f32.xlu0 %v824_v43  ;;  %v1062_v43 = vadd.s32 1, %v1008_v32 }
 0x917   :  { %v823_v44 = vmul.f32 %v821_v59, %v821_v59 }
 0x918   :  { %vm1066_vm9 = vcmp.lt.s32.totalorder %v1062_v43, 8  ;;  %v1687_v43 = vld [vmem:[%s2203_s2 + $0x70] sm:$0xff]  }
 0x919   :  { %v827_v45 = vsel %vm29_vm0, %v823_v44, 0.0 }
 0x91a   :  { %828 = vadd.xlane.f32.xlu1 %v827_v45 }
 0x99f   :  { %v826_v50 = vpop.xlane.xlu0 %825 }
 0x9a0   :  { %v830_v51 = vmul.f32 0.03125, %v826_v50 }
 0x9a2   :  { %v832_v52 = vadd.f32 1e-12, %v830_v51 }
 0x9a3   :  { %v829_v53 = vpop.xlane.xlu1 %828 }
 0x9a4   :  { %1732 = vrsqrt.f32 %v832_v52  ;;  %v831_v55 = vmul.f32 0.03125, %v829_v53 }
 0x9a6   :  { %v833_v56 = vadd.f32 1e-12, %v831_v55 }
 0x9a8   :  { %1734 = vrsqrt.f32 %v833_v56 }
 0x9b1   :  { %v1733_v57 = vpop.eup %1732 }
 0x9b2   :  { %v836_v58 = vmul.f32 %v1733_v57, %v820_v54  ;;  %v1033_v54 = vadd.s32 4294967295, %v1001_v31 }
 0x9b4   :  { %v843_v3 = vmul.f32 %v1465_v60, %v836_v58  ;;  %vm1035_vm6 = vcmp.ge.s32.totalorder %v1033_v54, 0 }
 0x9b5   :  { %v1735_v63 = vpop.eup %1734 }
 0x9b6   :  { %v837_v4 = vmul.f32 %v1735_v63, %v821_v59  ;;  %v850_v1 = vadd.f32 %v1466_v5, %v843_v3  ;;  %v1061_v59 = vadd.s32 1, %v1001_v31 }
 0x9b8   :  { %v844_v6 = vmul.f32 %v1465_v60, %v837_v4  ;;  %vm1065_vm8 = vcmp.lt.s32.totalorder %v1061_v59, 8  ;;  %v1686_v59 = vld [vmem:[%s2203_s2 + $0x78] sm:$0xff]  }
 0x9ba   :  { %v851_v8 = vadd.f32 %v1466_v5, %v844_v6 }
 0x9bc   :  { %v852_v10 = vpack.c.bf16 %v851_v8, %v850_v1 }
 0x9be   :  { %1621 = vmatmul.mubr.msk.bf16.vlgmr.msra.gmra.mxu1 %vm29_vm0, %v852_v10  ;;  %1629 = vmatmul.mubr.msk.bf16.vlgmr.msra.gmra.mxu0 %vm29_vm0, %v852_v10  ;;  %v1478_v10 = vld [vmem:[%s2204_s3 + $0xb8] ss:$0 sm:$0xff] }
 0x9bf   :  { %1636 = vmatprep.mubr.msk.bf16.mxu1 %vm1783_vm1, %v1782_v15  ;;  %1644 = vmatprep.mubr.msk.bf16.mxu0 %vm1783_vm1, %v1782_v15 }
 0x9c0   :  { %1633 = vmatpush3.bf16.msra.mxu1 %v1684_v11  ;;  %1641 = vmatpush3.bf16.msra.mxu0 %v1686_v59 }
 0x9c1   :  { %1634 = vmatprep.subr.bf16.mxu1 %v1782_v15  ;;  %1642 = vmatprep.subr.bf16.mxu0 %v1782_v15 }
 0x9c4   :  { %1635 = vmatpush3.bf16.msra.mxu1 %v1685_v12  ;;  %1643 = vmatpush3.bf16.msra.mxu0 %v1687_v43  ;;  %v1496_v43 = vld [vmem:[%s2204_s3 + $0x48] ss:$0 sm:$0xff] }
 0x9c5   :  { %1648 = vmatprep.subr.bf16.mxu1 %v1782_v15 }
 0xa7e   :  { %v911_v14 = vpop.f32.mrf.mxu1  ;;  %v973_v16 = vpop.f32.mrf.mxu0 }
 0xa7f   :  { %v974_v17 = vadd.f32 %v1471_v13, %v973_v16  ;;  %v912_v33 = vadd.f32 %v1467_v2, %v911_v14 }
 0xa80   :  { %v1622_v18 = vpop.f32.mrf.mxu1  ;;  %v1630_v19 = vpop.f32.mrf.mxu0 }
 0xa81   :  { %v980_v20 = vsub.f32 0.0, %v974_v17 }
 0xa82   :  { %v914_v21 = vpop.f32.mrf.mxu1  ;;  %v976_v22 = vpop.f32.mrf.mxu0 }
 0xa83   :  { %v982_v23 = vmul.f32 1.442695, %v980_v20  ;;  %v977_v24 = vadd.f32 %v1471_v13, %v976_v22  ;;  %v915_v36 = vadd.f32 %v1467_v2, %v914_v21 }
 0xa84   :  { %v1623_v25 = vpop.f32.mrf.mxu1  ;;  %v1631_v26 = vpop.f32.mrf.mxu0 }
 0xa85   :  { %1736 = vpow2.f32 %v982_v23  ;;  %v981_v27 = vsub.f32 0.0, %v977_v24 }
 0xa87   :  { %v984_v38 = vmul.f32 1.442695, %v981_v27 }
 0xa89   :  { %1738 = vpow2.f32 %v984_v38 }
 0xa92   :  { %v1737_v28 = vpop.eup %1736 }
 0xa93   :  { %v986_v29 = vadd.f32 1.0, %v1737_v28 }
 0xa95   :  { %1740 = vrcp.f32 %v986_v29  ;;  %v1482_v29 = vld [vmem:[%s2204_s3 + $0xc0] ss:$0 sm:$0xff] }
 0xa96   :  { %v1739_v0 = vpop.eup %1738 }
 0xa97   :  { %v987_v40 = vadd.f32 1.0, %v1739_v0 }
 0xa99   :  { %1742 = vrcp.f32 %v987_v40 }
 0xaa2   :  { %v1741_v7 = vpop.eup %1740 }
 0xaa3   :  { %v992_v35 = vmul.f32 %v1741_v7, %v912_v33 }
 0xaa5   :  { %v1028_v44 = vrot.slane %v992_v35, 7  ;;  %v1056_v45 = vrot.slane %v992_v35, 1  ;;  %v1026_v60 = vmul.f32 %v1475_v49, %v992_v35 }
 0xaa6   :  { %v1743_v37 = vpop.eup %1742 }
 0xaa7   :  { %v993_v41 = vmul.f32 %v1743_v37, %v915_v36 }
 0xaa9   :  { %v1029_v46 = vrot.slane %v993_v41, 7  ;;  %v1057_v47 = vrot.slane %v993_v41, 1  ;;  %v1027_v63 = vmul.f32 %v1475_v49, %v993_v41 }
 0xaab   :  { %v1031_v50 = vsel %vm1030_vm4, %v1028_v44, %v1029_v46  ;;  %v1032_v51 = vsel %vm1030_vm4, %v1029_v46, %v1028_v44  ;;  %v1059_v52 = vsel %vm1058_vm5, %v1056_v45, %v1057_v47  ;;  %v1060_v53 = vsel %vm1058_vm5, %v1057_v47, %v1056_v45  ;;  %v1688_v44 = vld [vmem:[%s2203_s2 + $0x98] sm:$0xff]  }
 0xaac   :  { %v1046_v55 = vmul.f32 %v1476_v42, %v1032_v51  ;;  %v1047_v56 = vmul.f32 %v1476_v42, %v1031_v50  ;;  %v1074_v57 = vmul.f32 %v1477_v48, %v1059_v52  ;;  %v1075_v58 = vmul.f32 %v1477_v48, %v1060_v53  ;;  %v1483_v53 = vld [vmem:[%s2204_s3 + $0x18] ss:$0 sm:$0xff] }
 0xaae   :  { %v1052_v3 = vsel %vm1035_vm6, %v1046_v55, 0.0  ;;  %v1053_v4 = vsel %vm1036_vm7, %v1047_v56, 0.0  ;;  %v1080_v1 = vsel %vm1065_vm8, %v1074_v57, 0.0  ;;  %v1081_v8 = vsel %vm1066_vm9, %v1075_v58, 0.0  ;;  %v1484_v58 = vld [vmem:[%s2204_s3 + $0x40] ss:$0 sm:$0xff] }
 0xaaf   :  { %v1054_v5 = vadd.f32 %v1052_v3, %v1026_v60  ;;  %v1055_v6 = vadd.f32 %v1053_v4, %v1027_v63 }
 0xab1   :  { %v1082_v11 = vadd.f32 %v1080_v1, %v1054_v5  ;;  %v1083_v12 = vadd.f32 %v1081_v8, %v1055_v6  ;;  %v1689_v5 = vld [vmem:[%s2203_s2 + $0x90] sm:$0xff]   ;;  %v1690_v6 = vld [vmem:[%s2203_s2 + $0x88] sm:$0xff]   ;;  %v1691_v1 = vld [vmem:[%s2203_s2 + $0x80] sm:$0xff]  }
 0xab2   :  { %v1485_v8 = vld [vmem:[%s2204_s3 + $0x80] ss:$0 sm:$0xff] }
 0xab3   :  { %v1089_v13 = vadd.f32 %v1478_v10, %v1082_v11  ;;  %v1090_v14 = vadd.f32 %v1478_v10, %v1083_v12 }
 0xab5   :  { %v1091_v16 = vsub.f32 0.0, %v1089_v13  ;;  %v1092_v17 = vsub.f32 0.0, %v1090_v14 }
 0xab7   :  { %v1093_v18 = vmul.f32 1.442695, %v1091_v16  ;;  %v1095_v19 = vmul.f32 1.442695, %v1092_v17 }
 0xab9   :  { %1744 = vpow2.f32 %v1093_v18 }
 0xaba   :  { %1746 = vpow2.f32 %v1095_v19 }
 0xac6   :  { %v1745_v20 = vpop.eup %1744 }
 0xac7   :  { %v1747_v21 = vpop.eup %1746  ;;  %v1097_v22 = vadd.f32 1.0, %v1745_v20 }
 0xac8   :  { %v1098_v23 = vadd.f32 1.0, %v1747_v21 }
 0xac9   :  { %1748 = vrcp.f32 %v1097_v22 }
 0xaca   :  { %1750 = vrcp.f32 %v1098_v23 }
 0xad6   :  { %v1749_v24 = vpop.eup %1748 }
 0xad7   :  { %v1751_v25 = vpop.eup %1750  ;;  %v1103_v26 = vmul.f32 %v1749_v24, %v1089_v13 }
 0xad8   :  { %v1104_v27 = vmul.f32 %v1751_v25, %v1090_v14 }
 0xada   :  { %v1105_v38 = vpack.c.bf16 %v1104_v27, %v1103_v26 }
 0xadc   :  { %1637 = vmatmul.mubr.msk.bf16.vlgmr.msra.gmra.mxu1 %vm29_vm0, %v1105_v38 }
 0xadd   :  { %1656 = vmatprep.mubr.msk.bf16.mxu1 %vm1783_vm1, %v1782_v15  ;;  %1649 = vmatpush3.bf16.msra.mxu1 %v1688_v44 }
 0xade   :  { %1650 = vmatprep.subr.bf16.mxu1 %v1782_v15 }
 0xae1   :  { %1651 = vmatpush3.bf16.msra.mxu1 %v1689_v5 }
 0xae2   :  { %1652 = vmatprep.subr.bf16.mxu1 %v1782_v15 }
 0xae5   :  { %1653 = vmatpush3.bf16.msra.mxu1 %v1690_v6 }
 0xae6   :  { %1654 = vmatprep.subr.bf16.mxu1 %v1782_v15  ;;  %v1489_v15 = vld [vmem:[%s2204_s3 + $0x88] ss:$0 sm:$0xff] }
 0xae9   :  { %1655 = vmatpush3.bf16.msra.mxu1 %v1691_v1 }
 0xb9c   :  { %v1159_v28 = vpop.f32.mrf.mxu1 }
 0xb9d   :  { %v1166_v0 = vadd.f32 %v1159_v28, %v2061_v9 }
 0xb9e   :  { %v1638_v30 = vpop.f32.mrf.mxu1 }
 0xb9f   :  { %v2135_v40 = vadd.f32 %v1482_v29, %v1166_v0 }
 0xba0   :  { %v1162_v61 = vpop.f32.mrf.mxu1 }
 0xba1   :  { %v1167_v62 = vadd.f32 %v1162_v61, %v2066_v34  ;;  %v1175_v2 = vsel %vm29_vm0, %v2135_v40, 0.0 }
 0xba2   :  { %1176 = vadd.xlane.f32.xlu0 %v1175_v2  ;;  %v1639_v7 = vpop.f32.mrf.mxu1 }
 0xba3   :  { %v2140_v31 = vadd.f32 %v1482_v29, %v1167_v62 }
 0xba5   :  { %v1178_v32 = vsel %vm29_vm0, %v2140_v31, 0.0 }
 0xba6   :  { %1179 = vadd.xlane.f32.xlu1 %v1178_v32 }
 0xc2b   :  { %v1177_v33 = vpop.xlane.xlu0 %1176 }
 0xc2c   :  { %v1181_v35 = vmul.f32 0.03125, %v1177_v33 }
 0xc2e   :  { %v1183_v9 = vsub.f32 %v2135_v40, %v1181_v35 }
 0xc2f   :  { %v1180_v36 = vpop.xlane.xlu1 %1179 }
 0xc30   :  { %v1182_v37 = vmul.f32 0.03125, %v1180_v36  ;;  %v1185_v54 = vmul.f32 %v1183_v9, %v1183_v9 }
 0xc32   :  { %v1184_v34 = vsub.f32 %v2140_v31, %v1182_v37  ;;  %v1187_v39 = vsel %vm29_vm0, %v1185_v54, 0.0 }
 0xc33   :  { %1188 = vadd.xlane.f32.xlu0 %v1187_v39 }
 0xc34   :  { %v1186_v41 = vmul.f32 %v1184_v34, %v1184_v34 }
 0xc36   :  { %v1190_v42 = vsel %vm29_vm0, %v1186_v41, 0.0 }
 0xc37   :  { %1191 = vadd.xlane.f32.xlu1 %v1190_v42  ;;  %v1495_v42 = vld [vmem:[%s2204_s3 + $0x20] ss:$0 sm:$0xff] }
 0xcbc   :  { %v1189_v45 = vpop.xlane.xlu0 %1188 }
 0xcbd   :  { %v1193_v46 = vmul.f32 0.03125, %v1189_v45 }
 0xcbf   :  { %v1195_v47 = vadd.f32 1e-12, %v1193_v46 }
 0xcc0   :  { %v1192_v48 = vpop.xlane.xlu1 %1191 }
 0xcc1   :  { %1752 = vrsqrt.f32 %v1195_v47  ;;  %v1194_v49 = vmul.f32 0.03125, %v1192_v48 }
 0xcc3   :  { %v1196_v50 = vadd.f32 1e-12, %v1194_v49 }
 0xcc5   :  { %1754 = vrsqrt.f32 %v1196_v50 }
 0xcce   :  { %v1753_v51 = vpop.eup %1752 }
 0xccf   :  { %v1199_v52 = vmul.f32 %v1753_v51, %v1183_v9 }
 0xcd1   :  { %v1206_v57 = vmul.f32 %v1483_v53, %v1199_v52 }
 0xcd2   :  { %v1755_v55 = vpop.eup %1754 }
 0xcd3   :  { %v1200_v56 = vmul.f32 %v1755_v55, %v1184_v34  ;;  %v1213_v63 = vadd.f32 %v1484_v58, %v1206_v57 }
 0xcd5   :  { %v1207_v60 = vmul.f32 %v1483_v53, %v1200_v56 }
 0xcd7   :  { %v1214_v3 = vadd.f32 %v1484_v58, %v1207_v60 }
 0xcd9   :  { %v1215_v4 = vpack.c.bf16 %v1214_v3, %v1213_v63 }
 0xcdb   :  { %1645 = vmatmul.mubr.msk.bf16.vlgmr.msra.gmra.mxu0 %vm29_vm0, %v1215_v4 }
 0xd9b   :  { %v1274_v10 = vpop.f32.mrf.mxu0 }
 0xd9c   :  { %v1275_v12 = vadd.f32 %v1485_v8, %v1274_v10 }
 0xd9d   :  { %v1646_v11 = vpop.f32.mrf.mxu0 }
 0xd9e   :  { %v1281_v17 = vmax.f32 %v1275_v12, 0.0 }
 0xd9f   :  { %v1277_v13 = vpop.f32.mrf.mxu0 }
 0xda0   :  { %v1278_v14 = vadd.f32 %v1485_v8, %v1277_v13 }
 0xda1   :  { %v1647_v16 = vpop.f32.mrf.mxu0 }
 0xda2   :  { %v1282_v18 = vmax.f32 %v1278_v14, 0.0 }
 0xda4   :  { %v1283_v19 = vpack.c.bf16 %v1282_v18, %v1281_v17 }
 0xda6   :  { %1657 = vmatmul.mubr.msk.bf16.vlgmr.msra.gmra.mxu1 %vm177_vm2, %v1283_v19 }
 0xe66   :  { %v1358_v20 = vpop.f32.mrf.mxu1 }
 0xe67   :  { %v1359_v21 = vadd.f32 %v1489_v15, %v1358_v20 }
 0xe68   :  { %v1658_v22 = vpop.f32.mrf.mxu1 }
 0xe69   :  { %v1365_v23 = vmul.f32 0.5, %v1359_v21 }
 0xe6a   :  { %v1361_v24 = vpop.f32.mrf.mxu1 }
 0xe6b   :  { %v1362_v25 = vadd.f32 %v1489_v15, %v1361_v24  ;;  %v1367_v26 = vadd.f32 %v1365_v23, %v2135_v40 }
 0xe6c   :  { %v1659_v27 = vpop.f32.mrf.mxu1 }
 0xe6d   :  { %v1366_v38 = vmul.f32 0.5, %v1362_v25  ;;  %v1369_v28 = vsel %vm29_vm0, %v1367_v26, 0.0 }
 0xe6e   :  { %1370 = vadd.xlane.f32.xlu0 %v1369_v28 }
 0xe6f   :  { %v1368_v29 = vadd.f32 %v1366_v38, %v2140_v31 }
 0xe71   :  { %v1372_v0 = vsel %vm29_vm0, %v1368_v29, 0.0 }
 0xe72   :  { %1373 = vadd.xlane.f32.xlu1 %v1372_v0 }
 0xef7   :  { %v1371_v30 = vpop.xlane.xlu0 %1370 }
 0xef8   :  { %v1375_v61 = vmul.f32 0.03125, %v1371_v30 }
 0xefa   :  { %v1377_v62 = vsub.f32 %v1367_v26, %v1375_v61 }
 0xefb   :  { %v1374_v2 = vpop.xlane.xlu1 %1373 }
 0xefc   :  { %v1376_v7 = vmul.f32 0.03125, %v1374_v2  ;;  %v1379_v32 = vmul.f32 %v1377_v62, %v1377_v62 }
 0xefe   :  { %v1378_v33 = vsub.f32 %v1368_v29, %v1376_v7  ;;  %v1381_v35 = vsel %vm29_vm0, %v1379_v32, 0.0 }
 0xeff   :  { %1382 = vadd.xlane.f32.xlu0 %v1381_v35 }
 0xf00   :  { %v1380_v40 = vmul.f32 %v1378_v33, %v1378_v33 }
 0xf02   :  { %v1384_v9 = vsel %vm29_vm0, %v1380_v40, 0.0 }
 0xf03   :  { %1385 = vadd.xlane.f32.xlu1 %v1384_v9 }
 0xf88   :  { %v1383_v36 = vpop.xlane.xlu0 %1382 }
 0xf89   :  { %v1387_v37 = vmul.f32 0.03125, %v1383_v36 }
 0xf8b   :  { %v1389_v31 = vadd.f32 1e-12, %v1387_v37 }
 0xf8c   :  { %v1386_v54 = vpop.xlane.xlu1 %1385 }
 0xf8d   :  { %1756 = vrsqrt.f32 %v1389_v31  ;;  %v1388_v34 = vmul.f32 0.03125, %v1386_v54 }
 0xf8f   :  { %v1390_v39 = vadd.f32 1e-12, %v1388_v34 }
 0xf91   :  { %1758 = vrsqrt.f32 %v1390_v39 }
 0xf9a   :  { %v1757_v41 = vpop.eup %1756 }
 0xf9b   :  { %v1393_v59 = vmul.f32 %v1757_v41, %v1377_v62 }
 0xf9d   :  { %v1400_v44 = vmul.f32 %v1495_v42, %v1393_v59 }
 0xf9e   :  { %v1759_v45 = vpop.eup %1758 }
 0xf9f   :  { %v1394_v46 = vmul.f32 %v1759_v45, %v1378_v33  ;;  %v1407_v47 = vadd.f32 %v1496_v43, %v1400_v44 }
 0xfa1   :  { %v1401_v48 = vmul.f32 %v1495_v42, %v1394_v46  ;;  %1409 = vst.msk [vmem:[#allocation2] sm:$0xff] %vm29_vm0, %v1407_v47 }
 0xfa3   :  { %v1408_v49 = vadd.f32 %v1496_v43, %v1401_v48 }
 0xfa5   :  { %1410 = vst.msk [vmem:[#allocation2 + $0x8] sm:$0xff] %vm29_vm0, %v1408_v49 }
 0xfa6   :  { %1771 = shalt.err (!%p1768_p4)
}
 0xfa7   :  { %s1785_s3 = smov 128   ;;  %s1786_s17 = smov 8  }
 0xfa8   :  { %1422 = dma.vmem_to_hbm [thread:$0]  %s1417_s15, 256, %s2205_s4, [#allocation3], %s1785_s3, %s1785_s3, %s1786_s17  }
 0xfa9   :  { %1780 = dma.done.wait [#allocation3], 256  }
 0xfaa   :  { %1781 = vsyncadd [#allocation3], 4294967040 }
 0xfab   :  { %1426 = vsyncpa [#allocation3], 1 }

</bundles_post_ra>
